<compile_context>
chip_gen: v7x
topology: tpu7x:2x2x1
jax: 0.10.0
libtpu: 0.0.40
codegen_flags: <defaults>
</compile_context>

<pallas_src>
import functools

import numpy as np
import jax
import jax.numpy as jnp
from jax import lax
from jax.experimental import pallas as pl
from jax.experimental.pallas import tpu as pltpu

EPS = 1e-8                                  # matches module-level EPS
F32_EPS = float(np.finfo(np.float32).eps)   # torch.finfo(float32).eps
PRELU_ALPHA = 0.25                          # nn.PReLU default (dim==1, not re-inited)


def _mosaic_params(semantics, per_step_bytes):
    # double-buffered pipeline blocks + slack; raise the default scoped VMEM
    # limit if needed, capped at v7x's 64 MiB physical per-core VMEM.
    limit = int(min(max(2 * per_step_bytes + (4 << 20), 32 << 20), 64 << 20))
    return pltpu.CompilerParams(dimension_semantics=semantics,
                                vmem_limit_bytes=limit)


# --------------------------------------------------------------------------
# Pallas kernels
# --------------------------------------------------------------------------
def _encoder_kernel(fr_ref, cos_ref, sin_ref, g_ref, b_ref, bn_ref,
                    re_ref, im_ref, y_ref, *, kf):
    """Windowed real DFT + log|.| + cLN + bottleneck 1x1 conv, one batch element.

    fr:  (1, L, Kp) bf16 frames (only the L window-supported samples).
    out: mix_re (1, N, Kp) f32, mix_im (1, N, Kp) f32, y_bottleneck (1, B, Kp) f32.
    Padded lanes [kf, Kp) of y are forced to zero (invariant for the separator).
    """
    fr = fr_ref[0]                                                       # (L, Kp) bf16
    re = jnp.dot(cos_ref[...], fr, preferred_element_type=jnp.float32)   # (N, Kp) f32
    im = jnp.dot(sin_ref[...], fr, preferred_element_type=jnp.float32)   # (N, Kp) f32
    re_ref[...] = re[None]
    im_ref[...] = im[None]

    # sqrt folded into log: log(max(|z|, eps)) == 0.5*log(max(|z|^2, eps^2))
    y = 0.5 * jnp.log(jnp.maximum(re * re + im * im, F32_EPS * F32_EPS))

    # cLN: per-frame statistics over channels (two-pass kept here: one call).
    mean = jnp.mean(y, axis=0, keepdims=True)
    cen = y - mean
    var = jnp.mean(cen * cen, axis=0, keepdims=True)
    yn = g_ref[...] * cen * lax.rsqrt(var + EPS) + b_ref[...]

    kp = y.shape[-1]
    kmask = (lax.broadcasted_iota(jnp.int32, (1, kp), 1) < kf).astype(jnp.float32)
    yn = yn * kmask                                        # zero padded lanes
    y_ref[...] = jnp.dot(bn_ref[...], yn.astype(jnp.bfloat16),
                         preferred_element_type=jnp.float32)[None]


def _separator_kernel(x_ref, w1_ref, g1_ref, b1_ref, dw_ref, g2_ref, b2_ref,
                      w2_ref, o_ref, y_sc, acc_sc, *, taps, n_sub, n_blocks, kf):
    """All R*X TemporalBlocks fused: grid = (batch m, block j).

    The running (B, Kp) activation lives in y_sc (VMEM) across the whole j
    axis; o_ref is written only at the last block.  Padded lanes stay zero.
    """
    j = pl.program_id(1)

    @pl.when(j == 0)
    def _():
        y_sc[...] = x_ref[0]

    y = y_sc[...]                                          # (B, Kp) f32
    kp = y.shape[-1]
    kmask = (lax.broadcasted_iota(jnp.int32, (1, kp), 1) < kf).astype(jnp.float32)

    def prelu_gln(h, g, b, mask_input):
        # PReLU (scalar alpha) + global LayerNorm, one-pass stats.
        # When the zero-lane invariant holds for h (mask_input=False) the sums
        # over all Kp lanes already equal the sums over the kf valid frames.
        if mask_input:
            h = h * kmask
        h = jnp.where(h >= 0, h, PRELU_ALPHA * h)
        inv_count = 1.0 / (h.shape[0] * kf)
        mean = jnp.sum(h) * inv_count
        var = jnp.maximum(jnp.sum(h * h) * inv_count - mean * mean, 0.0)
        return (g * (h - mean) * lax.rsqrt(var + EPS) + b) * kmask

    # 1x1 conv (B -> H); padded lanes of y are zero => padded lanes of h are zero.
    h = jnp.dot(w1_ref[0], y.astype(jnp.bfloat16),
                preferred_element_type=jnp.float32)                      # (H, Kp)
    h = prelu_gln(h, g1_ref[0], b1_ref[0], mask_input=False)

    # depthwise dilated conv ("same", zero padding).  Lanes >= kf of h are
    # zero and kf + pad <= Kp, so rotating into the padded region reproduces
    # the zero padding exactly for all valid output frames.  The dilation is
    # block-dependent (2**(j % n_sub)); pick it with static branches so the
    # roll shifts stay static.
    w = dw_ref[0]                                                        # (H, P) f32
    j_mod = j % n_sub
    for xi in range(n_sub):
        dil = 2 ** xi
        pad = (taps - 1) * dil // 2

        @pl.when(j_mod == xi)
        def _(dil=dil, pad=pad):
            acc = jnp.zeros_like(h)
            for p in range(taps):
                s = p * dil - pad            # out[:, k] += w[:, p] * h[:, k+s]
                shifted = h if s == 0 else pltpu.roll(h, shift=(-s) % kp, axis=1)
                acc = acc + w[:, p:p + 1] * shifted
            acc_sc[...] = acc

    # acc's padded lanes can contain rolled-in data -> mask stats explicitly.
    h2 = prelu_gln(acc_sc[...], g2_ref[0], b2_ref[0], mask_input=True)

    # pointwise conv (H -> B) + residual; padded lanes remain exactly zero.
    y_new = jnp.dot(w2_ref[0], h2.astype(jnp.bfloat16),
                    preferred_element_type=jnp.float32) + y
    y_sc[...] = y_new

    @pl.when(j == n_blocks - 1)
    def _():
        o_ref[...] = y_new[None]


def _decoder_kernel(y_ref, mw_ref, re_ref, im_ref, icos_ref, nisin_ref, o_ref,
                    *, C, N):
    """Mask 1x1 conv (all C speakers in one dot) + ReLU + mask*spectrum +
    windowed inverse real DFT.  Output: (1, C, L, Kp) time frames."""
    yb = y_ref[0].astype(jnp.bfloat16)                                   # (B, Kp)
    score = jnp.dot(mw_ref[...], yb, preferred_element_type=jnp.float32)  # (C*N, Kp)
    est_mask = jnp.maximum(score, 0.0)                    # ReLU mask nonlinearity
    re = re_ref[0]
    im = im_ref[0]
    for c in range(C):
        mc = est_mask[c * N:(c + 1) * N]                                 # (N, Kp)
        sre = (re * mc).astype(jnp.bfloat16)
        sim = (im * mc).astype(jnp.bfloat16)
        yfr = (jnp.dot(icos_ref[...], sre, preferred_element_type=jnp.float32)
               + jnp.dot(nisin_ref[...], sim, preferred_element_type=jnp.float32))
        o_ref[0, c, :, :] = yfr                                          # (L, Kp)


# --------------------------------------------------------------------------
# Pallas wrappers
# --------------------------------------------------------------------------
def encoder_call(frames, cosw, nsinw, g, b, bn_w, *, kf):
    M, Lw, Kp = frames.shape
    N = cosw.shape[0]
    Bc = bn_w.shape[0]
    vmem = (Lw * Kp * 2 + 2 * N * Lw * 2 + 2 * N * 4 + Bc * N * 2
            + 2 * N * Kp * 4 + Bc * Kp * 4)
    return pl.pallas_call(
        functools.partial(_encoder_kernel, kf=kf),
        out_shape=(jax.ShapeDtypeStruct((M, N, Kp), jnp.float32),
                   jax.ShapeDtypeStruct((M, N, Kp), jnp.float32),
                   jax.ShapeDtypeStruct((M, Bc, Kp), jnp.float32)),
        grid=(M,),
        in_specs=[pl.BlockSpec((1, Lw, Kp), lambda m: (m, 0, 0)),
                  pl.BlockSpec((N, Lw), lambda m: (0, 0)),
                  pl.BlockSpec((N, Lw), lambda m: (0, 0)),
                  pl.BlockSpec((N, 1), lambda m: (0, 0)),
                  pl.BlockSpec((N, 1), lambda m: (0, 0)),
                  pl.BlockSpec((Bc, N), lambda m: (0, 0))],
        out_specs=(pl.BlockSpec((1, N, Kp), lambda m: (m, 0, 0)),
                   pl.BlockSpec((1, N, Kp), lambda m: (m, 0, 0)),
                   pl.BlockSpec((1, Bc, Kp), lambda m: (m, 0, 0))),
        compiler_params=_mosaic_params(("parallel",), vmem),
    )(frames, cosw, nsinw, g, b, bn_w)


def separator_call(x, sep, *, taps, n_sub, kf):
    M, Bc, Kp = x.shape
    RX, H, _ = sep['w1'].shape
    vmem = (2 * Bc * Kp * 4                          # x block + out block
            + 2 * H * Bc * 2 + H * taps * 4 + 4 * H * 4
            + Bc * Kp * 4 + H * Kp * 4)              # scratches
    return pl.pallas_call(
        functools.partial(_separator_kernel, taps=taps, n_sub=n_sub,
                          n_blocks=RX, kf=kf),
        out_shape=jax.ShapeDtypeStruct((M, Bc, Kp), jnp.float32),
        grid=(M, RX),
        in_specs=[pl.BlockSpec((1, Bc, Kp), lambda m, j: (m, 0, 0)),
                  pl.BlockSpec((1, H, Bc), lambda m, j: (j, 0, 0)),
                  pl.BlockSpec((1, H, 1), lambda m, j: (j, 0, 0)),
                  pl.BlockSpec((1, H, 1), lambda m, j: (j, 0, 0)),
                  pl.BlockSpec((1, H, taps), lambda m, j: (j, 0, 0)),
                  pl.BlockSpec((1, H, 1), lambda m, j: (j, 0, 0)),
                  pl.BlockSpec((1, H, 1), lambda m, j: (j, 0, 0)),
                  pl.BlockSpec((1, Bc, H), lambda m, j: (j, 0, 0))],
        out_specs=pl.BlockSpec((1, Bc, Kp), lambda m, j: (m, 0, 0)),
        scratch_shapes=[pltpu.VMEM((Bc, Kp), jnp.float32),
                        pltpu.VMEM((H, Kp), jnp.float32)],
        compiler_params=_mosaic_params(("parallel", "arbitrary"), vmem),
    )(x, sep['w1'], sep['g1'], sep['b1'], sep['dw'], sep['g2'], sep['b2'],
      sep['w2'])


def decoder_call(y, mask_w, mix_re, mix_im, icosw, nisinw, *, C, N):
    M, Bc, Kp = y.shape
    Lw = icosw.shape[0]
    vmem = (Bc * Kp * 4 + C * N * Bc * 2 + 2 * N * Kp * 4 + 2 * Lw * N * 2
            + C * Lw * Kp * 4 + 2 * C * N * Kp * 4)
    return pl.pallas_call(
        functools.partial(_decoder_kernel, C=C, N=N),
        out_shape=jax.ShapeDtypeStruct((M, C, Lw, Kp), jnp.float32),
        grid=(M,),
        in_specs=[pl.BlockSpec((1, Bc, Kp), lambda m: (m, 0, 0)),
                  pl.BlockSpec((C * N, Bc), lambda m: (0, 0)),
                  pl.BlockSpec((1, N, Kp), lambda m: (m, 0, 0)),
                  pl.BlockSpec((1, N, Kp), lambda m: (m, 0, 0)),
                  pl.BlockSpec((Lw, N), lambda m: (0, 0)),
                  pl.BlockSpec((Lw, N), lambda m: (0, 0))],
        out_specs=pl.BlockSpec((1, C, Lw, Kp), lambda m: (m, 0, 0, 0)),
        compiler_params=_mosaic_params(("parallel",), vmem),
    )(y, mask_w, mix_re, mix_im, icosw, nisinw)


# --------------------------------------------------------------------------
# Parameter init (deterministic, xavier-normal-like scales — matches the
# PyTorch module, which xavier-inits every parameter with dim > 1 including
# the (1,C,1) norm gains/biases; PReLU alpha stays at 0.25).  Weights that
# feed the MXU are stored in bf16; norm params / depthwise taps stay f32.
# --------------------------------------------------------------------------
def init_params(key, N, B, H, P, X, R, C):
    def xavier(k, shape, fi, fo, dtype=jnp.float32):
        std = np.sqrt(2.0 / (fi + fo)).astype(np.float32)
        return (std * jax.random.normal(k, shape, jnp.float32)).astype(dtype)

    RX = R * X
    keys = iter(jax.random.split(key, 11))
    return {
        'cln_g': xavier(next(keys), (N, 1), N, 1),
        'cln_b': xavier(next(keys), (N, 1), N, 1),
        'bottleneck_w': xavier(next(keys), (B, N), N, B, jnp.bfloat16),
        'sep': {
            'w1': xavier(next(keys), (RX, H, B), B, H, jnp.bfloat16),
            'g1': xavier(next(keys), (RX, H, 1), H, 1),
            'b1': xavier(next(keys), (RX, H, 1), H, 1),
            'dw': xavier(next(keys), (RX, H, P), P, H * P),
            'g2': xavier(next(keys), (RX, H, 1), H, 1),
            'b2': xavier(next(keys), (RX, H, 1), H, 1),
            'w2': xavier(next(keys), (RX, B, H), H, B, jnp.bfloat16),
        },
        'mask_w': xavier(next(keys), (C * N, B), B, C * N, jnp.bfloat16),
    }


# --------------------------------------------------------------------------
# Full forward pass (Encoder STFT -> TemporalConvNet -> Decoder ISTFT)
# --------------------------------------------------------------------------
def conv_tasnet_forward(mixture, params, *, N, L, B, H, P, X, R, C):
    M, T = mixture.shape
    n_fft = (N - 1) * 2
    hop = L // 2
    left = (n_fft - L) // 2          # rect window of length L centered in n_fft

    # ---------------- STFT framing (plain-JAX glue) --------------------------
    # TODO(synk): framing gather / overlap-add scatter remain XLA gather/scatter.
    xpad = jnp.pad(mixture, ((0, 0), (n_fft // 2, n_fft // 2)), mode='reflect')
    Kf = 1 + (xpad.shape[1] - n_fft) // hop
    pad_max = (P - 1) * (2 ** (X - 1)) // 2
    Kp = ((Kf + pad_max + 127) // 128) * 128            # lane-dense frame axis
    assert Kf + pad_max <= Kp

    # Window sparsity: only the L window-supported samples per frame are used.
    frame_idx = (left + jnp.arange(L)[:, None]) + hop * jnp.arange(Kf)[None, :]
    frames = xpad[:, frame_idx]                                          # (M, L, Kf)
    frames = jnp.pad(frames, ((0, 0), (0, 0), (0, Kp - Kf))).astype(jnp.bfloat16)

    # analysis / synthesis DFT matrices restricted to the window support
    # (window value is 1 there), bf16 for the MXU.
    n = left + np.arange(L)
    f = np.arange(N)
    ang = 2.0 * np.pi * np.outer(f, n) / n_fft                           # (N, L)
    cosw = jnp.asarray(np.cos(ang), jnp.bfloat16)
    nsinw = jnp.asarray(-np.sin(ang), jnp.bfloat16)
    cf = np.full((N,), 2.0, np.float32)
    cf[0] = 1.0
    cf[N - 1] = 1.0                                                      # Nyquist
    icosw = jnp.asarray(np.cos(ang).T * cf[None, :] / n_fft, jnp.bfloat16)   # (L, N)
    nisinw = jnp.asarray(-np.sin(ang).T * cf[None, :] / n_fft, jnp.bfloat16)

    # ---------------- Encoder + log|.| + cLN + bottleneck (fused) -------------
    mix_re, mix_im, y = encoder_call(frames, cosw, nsinw,
                                     params['cln_g'], params['cln_b'],
                                     params['bottleneck_w'], kf=Kf)

    # ---------------- Separator: ALL R*X blocks in one fused kernel -----------
    y = separator_call(y, params['sep'], taps=P, n_sub=X, kf=Kf)

    # ---------------- Decoder: mask conv + mask*STFT + windowed iDFT (fused) --
    yframes = decoder_call(y, params['mask_w'], mix_re, mix_im, icosw, nisinw,
                           C=C, N=N)                                     # (M,C,L,Kp)

    # overlap-add (scatter) + window-envelope normalization — plain-JAX glue
    yfw = yframes[..., :Kf].reshape(M * C, L, Kf)
    Tpad = n_fft + hop * (Kf - 1)
    t_idx = hop * jnp.arange(Kf)[None, :] + left + jnp.arange(L)[:, None]  # (L, Kf)
    ypad = jnp.zeros((M * C, Tpad), jnp.float32).at[:, t_idx].add(yfw)
    env = jnp.zeros((Tpad,), jnp.float32).at[t_idx].add(jnp.ones((L, Kf), jnp.float32))
    start = n_fft // 2
    t_out = hop * (Kf - 1)
    env_c = env[start:start + t_out]
    # torch.istft errors on zero window coverage; guard keeps the output finite
    # without changing any sample that has coverage.
    env_c = jnp.where(env_c > 1e-11, env_c, 1.0)
    est = ypad[:, start:start + t_out] / env_c[None, :]
    est = est.reshape(M, C, t_out)

    # F.pad(est_source, (0, T_origin - T_conv))
    est = jnp.pad(est, ((0, 0), (0, 0), (0, T - t_out)))
    return est


# --------------------------------------------------------------------------
if __name__ == "__main__":
    # Small, consistent config: n_fft = (N-1)*2 = 16, hop = L//2 = 2
    N, L, B, H, P, X, R, C = 9, 4, 8, 16, 3, 2, 2, 2
    M, T = 2, 32

    key = jax.random.PRNGKey(0)
    k_param, k_mix = jax.random.split(key)
    params = init_params(k_param, N, B, H, P, X, R, C)
    mixture = jax.random.normal(k_mix, (M, T), jnp.float32)

    fwd = jax.jit(functools.partial(
        conv_tasnet_forward, N=N, L=L, B=B, H=H, P=P, X=X, R=R, C=C))
    est_source = fwd(mixture, params)
    jax.block_until_ready(est_source)

    assert est_source.shape == (M, C, T)
    assert bool(jnp.all(jnp.isfinite(est_source)))
    print("KERNEL_OK")
</pallas_src>

<mosaic_0001>
module attributes {stable_mosaic.version = 11 : i64} {
  func.func @_encoder_kernel(%arg0: i32, %arg1: memref<1x4x128xbf16, #tpu.memory_space<vmem>>, %arg2: memref<9x4xbf16, #tpu.memory_space<vmem>>, %arg3: memref<9x4xbf16, #tpu.memory_space<vmem>>, %arg4: memref<9x1xf32, #tpu.memory_space<vmem>>, %arg5: memref<9x1xf32, #tpu.memory_space<vmem>>, %arg6: memref<8x9xbf16, #tpu.memory_space<vmem>>, %arg7: memref<1x9x128xf32, #tpu.memory_space<vmem>>, %arg8: memref<1x9x128xf32, #tpu.memory_space<vmem>>, %arg9: memref<1x8x128xf32, #tpu.memory_space<vmem>>) attributes {dimension_semantics = [#tpu.dimension_semantics<parallel>], iteration_bounds = array<i64: 2>, scalar_prefetch = 0 : i64, scratch_operands = 0 : i64, tpu.core_type = #tpu.core_type<tc>, window_params = [{transform_indices = @transform_0, window_bounds = array<i64: 1, 4, 128>}, {pipeline_mode = #tpu.pipeline_mode<synchronous>, transform_indices = @transform_1, window_bounds = array<i64: 9, 4>}, {pipeline_mode = #tpu.pipeline_mode<synchronous>, transform_indices = @transform_2, window_bounds = array<i64: 9, 4>}, {pipeline_mode = #tpu.pipeline_mode<synchronous>, transform_indices = @transform_3, window_bounds = array<i64: 9, 1>}, {pipeline_mode = #tpu.pipeline_mode<synchronous>, transform_indices = @transform_4, window_bounds = array<i64: 9, 1>}, {pipeline_mode = #tpu.pipeline_mode<synchronous>, transform_indices = @transform_5, window_bounds = array<i64: 8, 9>}, {transform_indices = @transform_6, window_bounds = array<i64: 1, 9, 128>}, {transform_indices = @transform_7, window_bounds = array<i64: 1, 9, 128>}, {transform_indices = @transform_8, window_bounds = array<i64: 1, 8, 128>}]} {
    %c0 = arith.constant 0 : index
    %c0_0 = arith.constant 0 : index
    %c0_1 = arith.constant 0 : index
    %0 = vector.load %arg1[%c0, %c0_0, %c0_1] : memref<1x4x128xbf16, #tpu.memory_space<vmem>>, vector<1x4x128xbf16>
    %1 = vector.shape_cast %0 : vector<1x4x128xbf16> to vector<4x128xbf16>
    %c0_2 = arith.constant 0 : index
    %c0_3 = arith.constant 0 : index
    %2 = vector.load %arg2[%c0_2, %c0_3] : memref<9x4xbf16, #tpu.memory_space<vmem>>, vector<9x4xbf16>
    %cst = arith.constant dense<0.000000e+00> : vector<9x128xf32>
    %3 = tpu.matmul %2, %1, %cst {dimension_numbers = #tpu.dot_dimension_numbers<[1], [0], [0], [1], [0, 0, 1, 1], [], []>} : vector<9x4xbf16>, vector<4x128xbf16>, vector<9x128xf32> -> vector<9x128xf32>
    %c0_4 = arith.constant 0 : index
    %c0_5 = arith.constant 0 : index
    %4 = vector.load %arg3[%c0_4, %c0_5] : memref<9x4xbf16, #tpu.memory_space<vmem>>, vector<9x4xbf16>
    %cst_6 = arith.constant dense<0.000000e+00> : vector<9x128xf32>
    %5 = tpu.matmul %4, %1, %cst_6 {dimension_numbers = #tpu.dot_dimension_numbers<[1], [0], [0], [1], [0, 0, 1, 1], [], []>} : vector<9x4xbf16>, vector<4x128xbf16>, vector<9x128xf32> -> vector<9x128xf32>
    %6 = vector.shape_cast %3 : vector<9x128xf32> to vector<1x9x128xf32>
    %c0_7 = arith.constant 0 : index
    %c0_8 = arith.constant 0 : index
    %c0_9 = arith.constant 0 : index
    %7 = vector.load %arg7[%c0_7, %c0_8, %c0_9] : memref<1x9x128xf32, #tpu.memory_space<vmem>>, vector<1x9x128xf32>
    tpu.vector_store %arg7[%c0_7, %c0_8, %c0_9], %6 {strides = array<i32>} : memref<1x9x128xf32, #tpu.memory_space<vmem>>, vector<1x9x128xf32>,
    %8 = vector.shape_cast %5 : vector<9x128xf32> to vector<1x9x128xf32>
    %c0_10 = arith.constant 0 : index
    %c0_11 = arith.constant 0 : index
    %c0_12 = arith.constant 0 : index
    %9 = vector.load %arg8[%c0_10, %c0_11, %c0_12] : memref<1x9x128xf32, #tpu.memory_space<vmem>>, vector<1x9x128xf32>
    tpu.vector_store %arg8[%c0_10, %c0_11, %c0_12], %8 {strides = array<i32>} : memref<1x9x128xf32, #tpu.memory_space<vmem>>, vector<1x9x128xf32>,
    %10 = arith.mulf %3, %3 : vector<9x128xf32>
    %11 = arith.mulf %5, %5 : vector<9x128xf32>
    %12 = arith.addf %10, %11 : vector<9x128xf32>
    %cst_13 = arith.constant 1.42108547E-14 : f32
    %13 = vector.broadcast %cst_13 : f32 to vector<9x128xf32>
    %14 = arith.maximumf %12, %13 : vector<9x128xf32>
    %15 = math.log %14 : vector<9x128xf32>
    %cst_14 = arith.constant 5.000000e-01 : f32
    %16 = vector.broadcast %cst_14 : f32 to vector<9x128xf32>
    %17 = arith.mulf %16, %15 : vector<9x128xf32>
    %cst_15 = arith.constant dense<0.000000e+00> : vector<128xf32>
    %18 = vector.multi_reduction <add>, %17, %cst_15 [0] : vector<9x128xf32> to vector<128xf32>
    %19 = vector.shape_cast %18 : vector<128xf32> to vector<1x128xf32>
    %cst_16 = arith.constant 9.000000e+00 : f32
    %20 = vector.broadcast %cst_16 : f32 to vector<1x128xf32>
    %21 = arith.divf %19, %20 : vector<1x128xf32>
    %22 = vector.broadcast %21 : vector<1x128xf32> to vector<9x128xf32>
    %23 = arith.subf %17, %22 : vector<9x128xf32>
    %24 = arith.mulf %23, %23 : vector<9x128xf32>
    %cst_17 = arith.constant dense<0.000000e+00> : vector<128xf32>
    %25 = vector.multi_reduction <add>, %24, %cst_17 [0] : vector<9x128xf32> to vector<128xf32>
    %26 = vector.shape_cast %25 : vector<128xf32> to vector<1x128xf32>
    %cst_18 = arith.constant 9.000000e+00 : f32
    %27 = vector.broadcast %cst_18 : f32 to vector<1x128xf32>
    %28 = arith.divf %26, %27 : vector<1x128xf32>
    %c0_19 = arith.constant 0 : index
    %c0_20 = arith.constant 0 : index
    %29 = vector.load %arg4[%c0_19, %c0_20] : memref<9x1xf32, #tpu.memory_space<vmem>>, vector<9x1xf32>
    %30 = vector.broadcast %29 : vector<9x1xf32> to vector<9x128xf32>
    %31 = arith.mulf %30, %23 : vector<9x128xf32>
    %cst_21 = arith.constant 9.99999993E-9 : f32
    %32 = vector.broadcast %cst_21 : f32 to vector<1x128xf32>
    %33 = arith.addf %28, %32 : vector<1x128xf32>
    %34 = math.rsqrt %33 : vector<1x128xf32>
    %35 = vector.broadcast %34 : vector<1x128xf32> to vector<9x128xf32>
    %36 = arith.mulf %31, %35 : vector<9x128xf32>
    %c0_22 = arith.constant 0 : index
    %c0_23 = arith.constant 0 : index
    %37 = vector.load %arg5[%c0_22, %c0_23] : memref<9x1xf32, #tpu.memory_space<vmem>>, vector<9x1xf32>
    %38 = vector.broadcast %37 : vector<9x1xf32> to vector<9x128xf32>
    %39 = arith.addf %36, %38 : vector<9x128xf32>
    %40 = tpu.iota {dimensions = array<i32: 1>} : vector<1x128xi32>
    %c17_i32 = arith.constant 17 : i32
    %41 = vector.broadcast %c17_i32 : i32 to vector<1x128xi32>
    %42 = arith.cmpi slt, %40, %41 : vector<1x128xi32>
    %43 = arith.extui %42 : vector<1x128xi1> to vector<1x128xi32>
    %44 = arith.sitofp %43 : vector<1x128xi32> to vector<1x128xf32>
    %45 = vector.broadcast %44 : vector<1x128xf32> to vector<9x128xf32>
    %46 = arith.mulf %39, %45 : vector<9x128xf32>
    %c0_24 = arith.constant 0 : index
    %c0_25 = arith.constant 0 : index
    %47 = vector.load %arg6[%c0_24, %c0_25] : memref<8x9xbf16, #tpu.memory_space<vmem>>, vector<8x9xbf16>
    %48 = arith.truncf %46 : vector<9x128xf32> to vector<9x128xbf16>
    %cst_26 = arith.constant dense<0.000000e+00> : vector<8x128xf32>
    %49 = tpu.matmul %47, %48, %cst_26 {dimension_numbers = #tpu.dot_dimension_numbers<[1], [0], [0], [1], [0, 0, 1, 1], [], []>} : vector<8x9xbf16>, vector<9x128xbf16>, vector<8x128xf32> -> vector<8x128xf32>
    %50 = vector.shape_cast %49 : vector<8x128xf32> to vector<1x8x128xf32>
    %c0_27 = arith.constant 0 : index
    %c0_28 = arith.constant 0 : index
    %c0_29 = arith.constant 0 : index
    %51 = vector.load %arg9[%c0_27, %c0_28, %c0_29] : memref<1x8x128xf32, #tpu.memory_space<vmem>>, vector<1x8x128xf32>
    tpu.vector_store %arg9[%c0_27, %c0_28, %c0_29], %50 {strides = array<i32>} : memref<1x8x128xf32, #tpu.memory_space<vmem>>, vector<1x8x128xf32>,
    return
  }
  func.func @transform_0(%arg0: i32) -> (i32, i32, i32) {
    %c0_i32 = arith.constant 0 : i32
    %c0_i32_0 = arith.constant 0 : i32
    %c0_i32_1 = arith.constant 0 : i32
    return %arg0, %c0_i32, %c0_i32_0 : i32, i32, i32
  }
  func.func @transform_1(%arg0: i32) -> (i32, i32) {
    %c0_i32 = arith.constant 0 : i32
    %c0_i32_0 = arith.constant 0 : i32
    %c0_i32_1 = arith.constant 0 : i32
    return %c0_i32, %c0_i32_0 : i32, i32
  }
  func.func @transform_2(%arg0: i32) -> (i32, i32) {
    %c0_i32 = arith.constant 0 : i32
    %c0_i32_0 = arith.constant 0 : i32
    %c0_i32_1 = arith.constant 0 : i32
    return %c0_i32, %c0_i32_0 : i32, i32
  }
  func.func @transform_3(%arg0: i32) -> (i32, i32) {
    %c0_i32 = arith.constant 0 : i32
    %c0_i32_0 = arith.constant 0 : i32
    %c0_i32_1 = arith.constant 0 : i32
    return %c0_i32, %c0_i32_0 : i32, i32
  }
  func.func @transform_4(%arg0: i32) -> (i32, i32) {
    %c0_i32 = arith.constant 0 : i32
    %c0_i32_0 = arith.constant 0 : i32
    %c0_i32_1 = arith.constant 0 : i32
    return %c0_i32, %c0_i32_0 : i32, i32
  }
  func.func @transform_5(%arg0: i32) -> (i32, i32) {
    %c0_i32 = arith.constant 0 : i32
    %c0_i32_0 = arith.constant 0 : i32
    %c0_i32_1 = arith.constant 0 : i32
    return %c0_i32, %c0_i32_0 : i32, i32
  }
  func.func @transform_6(%arg0: i32) -> (i32, i32, i32) {
    %c0_i32 = arith.constant 0 : i32
    %c0_i32_0 = arith.constant 0 : i32
    %c0_i32_1 = arith.constant 0 : i32
    return %arg0, %c0_i32, %c0_i32_0 : i32, i32, i32
  }
  func.func @transform_7(%arg0: i32) -> (i32, i32, i32) {
    %c0_i32 = arith.constant 0 : i32
    %c0_i32_0 = arith.constant 0 : i32
    %c0_i32_1 = arith.constant 0 : i32
    return %arg0, %c0_i32, %c0_i32_0 : i32, i32, i32
  }
  func.func @transform_8(%arg0: i32) -> (i32, i32, i32) {
    %c0_i32 = arith.constant 0 : i32
    %c0_i32_0 = arith.constant 0 : i32
    %c0_i32_1 = arith.constant 0 : i32
    return %arg0, %c0_i32, %c0_i32_0 : i32, i32, i32
  }
}

module attributes {stable_mosaic.version = 11 : i64} {
  func.func @_decoder_kernel(%arg0: i32, %arg1: memref<1x8x128xf32, #tpu.memory_space<vmem>>, %arg2: memref<18x8xbf16, #tpu.memory_space<vmem>>, %arg3: memref<1x9x128xf32, #tpu.memory_space<vmem>>, %arg4: memref<1x9x128xf32, #tpu.memory_space<vmem>>, %arg5: memref<4x9xbf16, #tpu.memory_space<vmem>>, %arg6: memref<4x9xbf16, #tpu.memory_space<vmem>>, %arg7: memref<1x2x4x128xf32, #tpu.memory_space<vmem>>) attributes {dimension_semantics = [#tpu.dimension_semantics<parallel>], iteration_bounds = array<i64: 2>, scalar_prefetch = 0 : i64, scratch_operands = 0 : i64, tpu.core_type = #tpu.core_type<tc>, window_params = [{transform_indices = @transform_0, window_bounds = array<i64: 1, 8, 128>}, {pipeline_mode = #tpu.pipeline_mode<synchronous>, transform_indices = @transform_1, window_bounds = array<i64: 18, 8>}, {transform_indices = @transform_2, window_bounds = array<i64: 1, 9, 128>}, {transform_indices = @transform_3, window_bounds = array<i64: 1, 9, 128>}, {pipeline_mode = #tpu.pipeline_mode<synchronous>, transform_indices = @transform_4, window_bounds = array<i64: 4, 9>}, {pipeline_mode = #tpu.pipeline_mode<synchronous>, transform_indices = @transform_5, window_bounds = array<i64: 4, 9>}, {transform_indices = @transform_6, window_bounds = array<i64: 1, 2, 4, 128>}]} {
    %c0 = arith.constant 0 : index
    %c0_0 = arith.constant 0 : index
    %c0_1 = arith.constant 0 : index
    %0 = vector.load %arg1[%c0, %c0_0, %c0_1] : memref<1x8x128xf32, #tpu.memory_space<vmem>>, vector<1x8x128xf32>
    %1 = vector.shape_cast %0 : vector<1x8x128xf32> to vector<8x128xf32>
    %2 = arith.truncf %1 : vector<8x128xf32> to vector<8x128xbf16>
    %c0_2 = arith.constant 0 : index
    %c0_3 = arith.constant 0 : index
    %3 = vector.load %arg2[%c0_2, %c0_3] : memref<18x8xbf16, #tpu.memory_space<vmem>>, vector<18x8xbf16>
    %cst = arith.constant dense<0.000000e+00> : vector<18x128xf32>
    %4 = tpu.matmul %3, %2, %cst {dimension_numbers = #tpu.dot_dimension_numbers<[1], [0], [0], [1], [0, 0, 1, 1], [], []>} : vector<18x8xbf16>, vector<8x128xbf16>, vector<18x128xf32> -> vector<18x128xf32>
    %cst_4 = arith.constant 0.000000e+00 : f32
    %5 = vector.broadcast %cst_4 : f32 to vector<18x128xf32>
    %6 = arith.maximumf %4, %5 : vector<18x128xf32>
    %c0_5 = arith.constant 0 : index
    %c0_6 = arith.constant 0 : index
    %c0_7 = arith.constant 0 : index
    %7 = vector.load %arg3[%c0_5, %c0_6, %c0_7] : memref<1x9x128xf32, #tpu.memory_space<vmem>>, vector<1x9x128xf32>
    %8 = vector.shape_cast %7 : vector<1x9x128xf32> to vector<9x128xf32>
    %c0_8 = arith.constant 0 : index
    %c0_9 = arith.constant 0 : index
    %c0_10 = arith.constant 0 : index
    %9 = vector.load %arg4[%c0_8, %c0_9, %c0_10] : memref<1x9x128xf32, #tpu.memory_space<vmem>>, vector<1x9x128xf32>
    %10 = vector.shape_cast %9 : vector<1x9x128xf32> to vector<9x128xf32>
    %11 = vector.extract_strided_slice %6 {offsets = [0, 0], sizes = [9, 128], strides = [1, 1]} : vector<18x128xf32> to vector<9x128xf32>
    %12 = arith.mulf %8, %11 : vector<9x128xf32>
    %13 = arith.truncf %12 : vector<9x128xf32> to vector<9x128xbf16>
    %14 = arith.mulf %10, %11 : vector<9x128xf32>
    %15 = arith.truncf %14 : vector<9x128xf32> to vector<9x128xbf16>
    %c0_11 = arith.constant 0 : index
    %c0_12 = arith.constant 0 : index
    %16 = vector.load %arg5[%c0_11, %c0_12] : memref<4x9xbf16, #tpu.memory_space<vmem>>, vector<4x9xbf16>
    %cst_13 = arith.constant dense<0.000000e+00> : vector<4x128xf32>
    %17 = tpu.matmul %16, %13, %cst_13 {dimension_numbers = #tpu.dot_dimension_numbers<[1], [0], [0], [1], [0, 0, 1, 1], [], []>} : vector<4x9xbf16>, vector<9x128xbf16>, vector<4x128xf32> -> vector<4x128xf32>
    %c0_14 = arith.constant 0 : index
    %c0_15 = arith.constant 0 : index
    %18 = vector.load %arg6[%c0_14, %c0_15] : memref<4x9xbf16, #tpu.memory_space<vmem>>, vector<4x9xbf16>
    %cst_16 = arith.constant dense<0.000000e+00> : vector<4x128xf32>
    %19 = tpu.matmul %18, %15, %cst_16 {dimension_numbers = #tpu.dot_dimension_numbers<[1], [0], [0], [1], [0, 0, 1, 1], [], []>} : vector<4x9xbf16>, vector<9x128xbf16>, vector<4x128xf32> -> vector<4x128xf32>
    %20 = arith.addf %17, %19 : vector<4x128xf32>
    %c0_17 = arith.constant 0 : index
    %c0_18 = arith.constant 0 : index
    %c0_19 = arith.constant 0 : index
    %c0_20 = arith.constant 0 : index
    %21 = vector.load %arg7[%c0_17, %c0_18, %c0_19, %c0_20] : memref<1x2x4x128xf32, #tpu.memory_space<vmem>>, vector<1x1x4x128xf32>
    %22 = vector.shape_cast %21 : vector<1x1x4x128xf32> to vector<4x128xf32>
    %23 = vector.shape_cast %20 : vector<4x128xf32> to vector<1x1x4x128xf32>
    tpu.vector_store %arg7[%c0_17, %c0_18, %c0_19, %c0_20], %23 {strides = array<i32>} : memref<1x2x4x128xf32, #tpu.memory_space<vmem>>, vector<1x1x4x128xf32>,
    %24 = vector.extract_strided_slice %6 {offsets = [9, 0], sizes = [9, 128], strides = [1, 1]} : vector<18x128xf32> to vector<9x128xf32>
    %25 = arith.mulf %8, %24 : vector<9x128xf32>
    %26 = arith.truncf %25 : vector<9x128xf32> to vector<9x128xbf16>
    %27 = arith.mulf %10, %24 : vector<9x128xf32>
    %28 = arith.truncf %27 : vector<9x128xf32> to vector<9x128xbf16>
    %c0_21 = arith.constant 0 : index
    %c0_22 = arith.constant 0 : index
    %29 = vector.load %arg5[%c0_21, %c0_22] : memref<4x9xbf16, #tpu.memory_space<vmem>>, vector<4x9xbf16>
    %cst_23 = arith.constant dense<0.000000e+00> : vector<4x128xf32>
    %30 = tpu.matmul %29, %26, %cst_23 {dimension_numbers = #tpu.dot_dimension_numbers<[1], [0], [0], [1], [0, 0, 1, 1], [], []>} : vector<4x9xbf16>, vector<9x128xbf16>, vector<4x128xf32> -> vector<4x128xf32>
    %c0_24 = arith.constant 0 : index
    %c0_25 = arith.constant 0 : index
    %31 = vector.load %arg6[%c0_24, %c0_25] : memref<4x9xbf16, #tpu.memory_space<vmem>>, vector<4x9xbf16>
    %cst_26 = arith.constant dense<0.000000e+00> : vector<4x128xf32>
    %32 = tpu.matmul %31, %28, %cst_26 {dimension_numbers = #tpu.dot_dimension_numbers<[1], [0], [0], [1], [0, 0, 1, 1], [], []>} : vector<4x9xbf16>, vector<9x128xbf16>, vector<4x128xf32> -> vector<4x128xf32>
    %33 = arith.addf %30, %32 : vector<4x128xf32>
    %c0_27 = arith.constant 0 : index
    %c1 = arith.constant 1 : index
    %c0_28 = arith.constant 0 : index
    %c0_29 = arith.constant 0 : index
    %34 = vector.load %arg7[%c0_27, %c1, %c0_28, %c0_29] : memref<1x2x4x128xf32, #tpu.memory_space<vmem>>, vector<1x1x4x128xf32>
    %35 = vector.shape_cast %34 : vector<1x1x4x128xf32> to vector<4x128xf32>
    %36 = vector.shape_cast %33 : vector<4x128xf32> to vector<1x1x4x128xf32>
    tpu.vector_store %arg7[%c0_27, %c1, %c0_28, %c0_29], %36 {strides = array<i32>} : memref<1x2x4x128xf32, #tpu.memory_space<vmem>>, vector<1x1x4x128xf32>,
    return
  }
  func.func @transform_0(%arg0: i32) -> (i32, i32, i32) {
    %c0_i32 = arith.constant 0 : i32
    %c0_i32_0 = arith.constant 0 : i32
    %c0_i32_1 = arith.constant 0 : i32
    return %arg0, %c0_i32, %c0_i32_0 : i32, i32, i32
  }
  func.func @transform_1(%arg0: i32) -> (i32, i32) {
    %c0_i32 = arith.constant 0 : i32
    %c0_i32_0 = arith.constant 0 : i32
    %c0_i32_1 = arith.constant 0 : i32
    return %c0_i32, %c0_i32_0 : i32, i32
  }
  func.func @transform_2(%arg0: i32) -> (i32, i32, i32) {
    %c0_i32 = arith.constant 0 : i32
    %c0_i32_0 = arith.constant 0 : i32
    %c0_i32_1 = arith.constant 0 : i32
    return %arg0, %c0_i32, %c0_i32_0 : i32, i32, i32
  }
  func.func @transform_3(%arg0: i32) -> (i32, i32, i32) {
    %c0_i32 = arith.constant 0 : i32
    %c0_i32_0 = arith.constant 0 : i32
    %c0_i32_1 = arith.constant 0 : i32
    return %arg0, %c0_i32, %c0_i32_0 : i32, i32, i32
  }
  func.func @transform_4(%arg0: i32) -> (i32, i32) {
    %c0_i32 = arith.constant 0 : i32
    %c0_i32_0 = arith.constant 0 : i32
    %c0_i32_1 = arith.constant 0 : i32
    return %c0_i32, %c0_i32_0 : i32, i32
  }
  func.func @transform_5(%arg0: i32) -> (i32, i32) {
    %c0_i32 = arith.constant 0 : i32
    %c0_i32_0 = arith.constant 0 : i32
    %c0_i32_1 = arith.constant 0 : i32
    return %c0_i32, %c0_i32_0 : i32, i32
  }
  func.func @transform_6(%arg0: i32) -> (i32, i32, i32, i32) {
    %c0_i32 = arith.constant 0 : i32
    %c0_i32_0 = arith.constant 0 : i32
    %c0_i32_1 = arith.constant 0 : i32
    %c0_i32_2 = arith.constant 0 : i32
    return %arg0, %c0_i32, %c0_i32_0, %c0_i32_1 : i32, i32, i32, i32
  }
}

module attributes {stable_mosaic.version = 11 : i64} {
  func.func @_separator_kernel(%arg0: i32, %arg1: i32, %arg2: memref<1x8x128xf32, #tpu.memory_space<vmem>>, %arg3: memref<1x16x8xbf16, #tpu.memory_space<vmem>>, %arg4: memref<1x16x1xf32, #tpu.memory_space<vmem>>, %arg5: memref<1x16x1xf32, #tpu.memory_space<vmem>>, %arg6: memref<1x16x3xf32, #tpu.memory_space<vmem>>, %arg7: memref<1x16x1xf32, #tpu.memory_space<vmem>>, %arg8: memref<1x16x1xf32, #tpu.memory_space<vmem>>, %arg9: memref<1x8x16xbf16, #tpu.memory_space<vmem>>, %arg10: memref<1x8x128xf32, #tpu.memory_space<vmem>>, %arg11: memref<8x128xf32, #tpu.memory_space<vmem>>, %arg12: memref<16x128xf32, #tpu.memory_space<vmem>>) attributes {dimension_semantics = [#tpu.dimension_semantics<parallel>, #tpu.dimension_semantics<arbitrary>], iteration_bounds = array<i64: 2, 4>, scalar_prefetch = 0 : i64, scratch_operands = 2 : i64, tpu.core_type = #tpu.core_type<tc>, window_params = [{transform_indices = @transform_0, window_bounds = array<i64: 1, 8, 128>}, {transform_indices = @transform_1, window_bounds = array<i64: 1, 16, 8>}, {transform_indices = @transform_2, window_bounds = array<i64: 1, 16, 1>}, {transform_indices = @transform_3, window_bounds = array<i64: 1, 16, 1>}, {transform_indices = @transform_4, window_bounds = array<i64: 1, 16, 3>}, {transform_indices = @transform_5, window_bounds = array<i64: 1, 16, 1>}, {transform_indices = @transform_6, window_bounds = array<i64: 1, 16, 1>}, {transform_indices = @transform_7, window_bounds = array<i64: 1, 8, 16>}, {transform_indices = @transform_8, window_bounds = array<i64: 1, 8, 128>}]} {
    %c0_i32 = arith.constant 0 : i32
    %0 = arith.cmpi eq, %arg1, %c0_i32 : i32
    %1 = arith.extui %0 : i1 to i32
    %c0_i32_0 = arith.constant 0 : i32
    %2 = arith.cmpi ne, %1, %c0_i32_0 : i32
    scf.if %2 {
      %c0_53 = arith.constant 0 : index
      %c0_54 = arith.constant 0 : index
      %c0_55 = arith.constant 0 : index
      %113 = vector.load %arg2[%c0_53, %c0_54, %c0_55] : memref<1x8x128xf32, #tpu.memory_space<vmem>>, vector<1x8x128xf32>
      %114 = vector.shape_cast %113 : vector<1x8x128xf32> to vector<8x128xf32>
      %c0_56 = arith.constant 0 : index
      %c0_57 = arith.constant 0 : index
      %115 = vector.load %arg11[%c0_56, %c0_57] : memref<8x128xf32, #tpu.memory_space<vmem>>, vector<8x128xf32>
      tpu.vector_store %arg11[%c0_56, %c0_57], %114 {strides = array<i32>} : memref<8x128xf32, #tpu.memory_space<vmem>>, vector<8x128xf32>,
    } else {
    }
    %c0 = arith.constant 0 : index
    %c0_1 = arith.constant 0 : index
    %3 = vector.load %arg11[%c0, %c0_1] : memref<8x128xf32, #tpu.memory_space<vmem>>, vector<8x128xf32>
    %4 = tpu.iota {dimensions = array<i32: 1>} : vector<1x128xi32>
    %c17_i32 = arith.constant 17 : i32
    %5 = vector.broadcast %c17_i32 : i32 to vector<1x128xi32>
    %6 = arith.cmpi slt, %4, %5 : vector<1x128xi32>
    %7 = arith.extui %6 : vector<1x128xi1> to vector<1x128xi32>
    %8 = arith.sitofp %7 : vector<1x128xi32> to vector<1x128xf32>
    %c0_2 = arith.constant 0 : index
    %c0_3 = arith.constant 0 : index
    %c0_4 = arith.constant 0 : index
    %9 = vector.load %arg3[%c0_2, %c0_3, %c0_4] : memref<1x16x8xbf16, #tpu.memory_space<vmem>>, vector<1x16x8xbf16>
    %10 = vector.shape_cast %9 : vector<1x16x8xbf16> to vector<16x8xbf16>
    %11 = arith.truncf %3 : vector<8x128xf32> to vector<8x128xbf16>
    %cst = arith.constant dense<0.000000e+00> : vector<16x128xf32>
    %12 = tpu.matmul %10, %11, %cst {dimension_numbers = #tpu.dot_dimension_numbers<[1], [0], [0], [1], [0, 0, 1, 1], [], []>} : vector<16x8xbf16>, vector<8x128xbf16>, vector<16x128xf32> -> vector<16x128xf32>
    %c0_5 = arith.constant 0 : index
    %c0_6 = arith.constant 0 : index
    %c0_7 = arith.constant 0 : index
    %13 = vector.load %arg4[%c0_5, %c0_6, %c0_7] : memref<1x16x1xf32, #tpu.memory_space<vmem>>, vector<1x16x1xf32>
    %14 = vector.shape_cast %13 : vector<1x16x1xf32> to vector<16x1xf32>
    %c0_8 = arith.constant 0 : index
    %c0_9 = arith.constant 0 : index
    %c0_10 = arith.constant 0 : index
    %15 = vector.load %arg5[%c0_8, %c0_9, %c0_10] : memref<1x16x1xf32, #tpu.memory_space<vmem>>, vector<1x16x1xf32>
    %16 = vector.shape_cast %15 : vector<1x16x1xf32> to vector<16x1xf32>
    %cst_11 = arith.constant 0.000000e+00 : f32
    %17 = vector.broadcast %cst_11 : f32 to vector<16x128xf32>
    %18 = arith.cmpf oge, %12, %17 : vector<16x128xf32>
    %cst_12 = arith.constant 2.500000e-01 : f32
    %19 = vector.broadcast %cst_12 : f32 to vector<16x128xf32>
    %20 = arith.mulf %19, %12 : vector<16x128xf32>
    %21 = arith.select %18, %12, %20 : vector<16x128xi1>, vector<16x128xf32>
    %22 = vector.shape_cast %21 : vector<16x128xf32> to vector<1x16x128xf32>
    %cst_13 = arith.constant dense<0.000000e+00> : vector<1xf32>
    %23 = vector.multi_reduction <add>, %22, %cst_13 [1, 2] : vector<1x16x128xf32> to vector<1xf32>
    %24 = vector.shape_cast %23 : vector<1xf32> to vector<1x1x1xf32>
    %25 = vector.extract %24[0, 0, 0] : f32 from vector<1x1x1xf32>
    %cst_14 = arith.constant 0.0036764706 : f32
    %26 = arith.mulf %25, %cst_14 : f32
    %27 = arith.mulf %21, %21 : vector<16x128xf32>
    %28 = vector.shape_cast %27 : vector<16x128xf32> to vector<1x16x128xf32>
    %cst_15 = arith.constant dense<0.000000e+00> : vector<1xf32>
    %29 = vector.multi_reduction <add>, %28, %cst_15 [1, 2] : vector<1x16x128xf32> to vector<1xf32>
    %30 = vector.shape_cast %29 : vector<1xf32> to vector<1x1x1xf32>
    %31 = vector.extract %30[0, 0, 0] : f32 from vector<1x1x1xf32>
    %cst_16 = arith.constant 0.0036764706 : f32
    %32 = arith.mulf %31, %cst_16 : f32
    %33 = arith.mulf %26, %26 : f32
    %34 = arith.subf %32, %33 : f32
    %cst_17 = arith.constant 0.000000e+00 : f32
    %35 = arith.maximumf %34, %cst_17 : f32
    %36 = vector.broadcast %26 : f32 to vector<16x128xf32>
    %37 = arith.subf %21, %36 : vector<16x128xf32>
    %38 = vector.broadcast %14 : vector<16x1xf32> to vector<16x128xf32>
    %39 = arith.mulf %38, %37 : vector<16x128xf32>
    %cst_18 = arith.constant 9.99999993E-9 : f32
    %40 = arith.addf %35, %cst_18 : f32
    %41 = math.rsqrt %40 : f32
    %42 = vector.broadcast %41 : f32 to vector<16x128xf32>
    %43 = arith.mulf %39, %42 : vector<16x128xf32>
    %44 = vector.broadcast %16 : vector<16x1xf32> to vector<16x128xf32>
    %45 = arith.addf %43, %44 : vector<16x128xf32>
    %46 = vector.broadcast %8 : vector<1x128xf32> to vector<16x128xf32>
    %47 = arith.mulf %45, %46 : vector<16x128xf32>
    %c0_19 = arith.constant 0 : index
    %c0_20 = arith.constant 0 : index
    %c0_21 = arith.constant 0 : index
    %48 = vector.load %arg6[%c0_19, %c0_20, %c0_21] : memref<1x16x3xf32, #tpu.memory_space<vmem>>, vector<1x16x3xf32>
    %49 = vector.shape_cast %48 : vector<1x16x3xf32> to vector<16x3xf32>
    %c2_i32 = arith.constant 2 : i32
    %c0_i32_22 = arith.constant 0 : i32
    %50 = arith.cmpi eq, %c2_i32, %c0_i32_22 : i32
    %c1_i32 = arith.constant 1 : i32
    %51 = arith.select %50, %c1_i32, %c2_i32 : i32
    %52 = arith.remsi %arg1, %51 : i32
    %c0_i32_23 = arith.constant 0 : i32
    %53 = arith.cmpi ne, %52, %c0_i32_23 : i32
    %c0_i32_24 = arith.constant 0 : i32
    %54 = arith.cmpi slt, %52, %c0_i32_24 : i32
    %c0_i32_25 = arith.constant 0 : i32
    %55 = arith.cmpi slt, %51, %c0_i32_25 : i32
    %56 = arith.xori %54, %55 : i1
    %57 = arith.andi %56, %53 : i1
    %58 = arith.addi %52, %51 : i32
    %59 = arith.select %57, %58, %52 : i32
    %c0_i32_26 = arith.constant 0 : i32
    %60 = arith.cmpi eq, %59, %c0_i32_26 : i32
    %61 = arith.extui %60 : i1 to i32
    %c0_i32_27 = arith.constant 0 : i32
    %62 = arith.cmpi ne, %61, %c0_i32_27 : i32
    scf.if %62 {
      %cst_53 = arith.constant 0.000000e+00 : f32
      %113 = vector.broadcast %cst_53 : f32 to vector<16x128xf32>
      %c1_i32_54 = arith.constant 1 : i32
      %114 = tpu.dynamic_rotate %47 by %c1_i32_54 dim 1 : vector<16x128xf32>, i32 -> vector<16x128xf32>
      %115 = vector.extract_strided_slice %49 {offsets = [0, 0], sizes = [16, 1], strides = [1, 1]} : vector<16x3xf32> to vector<16x1xf32>
      %116 = vector.broadcast %115 : vector<16x1xf32> to vector<16x128xf32>
      %117 = arith.mulf %116, %114 : vector<16x128xf32>
      %118 = arith.addf %113, %117 : vector<16x128xf32>
      %119 = vector.extract_strided_slice %49 {offsets = [0, 1], sizes = [16, 1], strides = [1, 1]} : vector<16x3xf32> to vector<16x1xf32>
      %120 = vector.broadcast %119 : vector<16x1xf32> to vector<16x128xf32>
      %121 = arith.mulf %120, %47 : vector<16x128xf32>
      %122 = arith.addf %118, %121 : vector<16x128xf32>
      %c127_i32 = arith.constant 127 : i32
      %123 = tpu.dynamic_rotate %47 by %c127_i32 dim 1 : vector<16x128xf32>, i32 -> vector<16x128xf32>
      %124 = vector.extract_strided_slice %49 {offsets = [0, 2], sizes = [16, 1], strides = [1, 1]} : vector<16x3xf32> to vector<16x1xf32>
      %125 = vector.broadcast %124 : vector<16x1xf32> to vector<16x128xf32>
      %126 = arith.mulf %125, %123 : vector<16x128xf32>
      %127 = arith.addf %122, %126 : vector<16x128xf32>
      %c0_55 = arith.constant 0 : index
      %c0_56 = arith.constant 0 : index
      %128 = vector.load %arg12[%c0_55, %c0_56] : memref<16x128xf32, #tpu.memory_space<vmem>>, vector<16x128xf32>
      tpu.vector_store %arg12[%c0_55, %c0_56], %127 {strides = array<i32>} : memref<16x128xf32, #tpu.memory_space<vmem>>, vector<16x128xf32>,
    } else {
    }
    %c1_i32_28 = arith.constant 1 : i32
    %63 = arith.cmpi eq, %59, %c1_i32_28 : i32
    %64 = arith.extui %63 : i1 to i32
    %c0_i32_29 = arith.constant 0 : i32
    %65 = arith.cmpi ne, %64, %c0_i32_29 : i32
    scf.if %65 {
      %cst_53 = arith.constant 0.000000e+00 : f32
      %113 = vector.broadcast %cst_53 : f32 to vector<16x128xf32>
      %c2_i32_54 = arith.constant 2 : i32
      %114 = tpu.dynamic_rotate %47 by %c2_i32_54 dim 1 : vector<16x128xf32>, i32 -> vector<16x128xf32>
      %115 = vector.extract_strided_slice %49 {offsets = [0, 0], sizes = [16, 1], strides = [1, 1]} : vector<16x3xf32> to vector<16x1xf32>
      %116 = vector.broadcast %115 : vector<16x1xf32> to vector<16x128xf32>
      %117 = arith.mulf %116, %114 : vector<16x128xf32>
      %118 = arith.addf %113, %117 : vector<16x128xf32>
      %119 = vector.extract_strided_slice %49 {offsets = [0, 1], sizes = [16, 1], strides = [1, 1]} : vector<16x3xf32> to vector<16x1xf32>
      %120 = vector.broadcast %119 : vector<16x1xf32> to vector<16x128xf32>
      %121 = arith.mulf %120, %47 : vector<16x128xf32>
      %122 = arith.addf %118, %121 : vector<16x128xf32>
      %c126_i32 = arith.constant 126 : i32
      %123 = tpu.dynamic_rotate %47 by %c126_i32 dim 1 : vector<16x128xf32>, i32 -> vector<16x128xf32>
      %124 = vector.extract_strided_slice %49 {offsets = [0, 2], sizes = [16, 1], strides = [1, 1]} : vector<16x3xf32> to vector<16x1xf32>
      %125 = vector.broadcast %124 : vector<16x1xf32> to vector<16x128xf32>
      %126 = arith.mulf %125, %123 : vector<16x128xf32>
      %127 = arith.addf %122, %126 : vector<16x128xf32>
      %c0_55 = arith.constant 0 : index
      %c0_56 = arith.constant 0 : index
      %128 = vector.load %arg12[%c0_55, %c0_56] : memref<16x128xf32, #tpu.memory_space<vmem>>, vector<16x128xf32>
      tpu.vector_store %arg12[%c0_55, %c0_56], %127 {strides = array<i32>} : memref<16x128xf32, #tpu.memory_space<vmem>>, vector<16x128xf32>,
    } else {
    }
    %c0_30 = arith.constant 0 : index
    %c0_31 = arith.constant 0 : index
    %66 = vector.load %arg12[%c0_30, %c0_31] : memref<16x128xf32, #tpu.memory_space<vmem>>, vector<16x128xf32>
    %c0_32 = arith.constant 0 : index
    %c0_33 = arith.constant 0 : index
    %c0_34 = arith.constant 0 : index
    %67 = vector.load %arg7[%c0_32, %c0_33, %c0_34] : memref<1x16x1xf32, #tpu.memory_space<vmem>>, vector<1x16x1xf32>
    %68 = vector.shape_cast %67 : vector<1x16x1xf32> to vector<16x1xf32>
    %c0_35 = arith.constant 0 : index
    %c0_36 = arith.constant 0 : index
    %c0_37 = arith.constant 0 : index
    %69 = vector.load %arg8[%c0_35, %c0_36, %c0_37] : memref<1x16x1xf32, #tpu.memory_space<vmem>>, vector<1x16x1xf32>
    %70 = vector.shape_cast %69 : vector<1x16x1xf32> to vector<16x1xf32>
    %71 = vector.broadcast %8 : vector<1x128xf32> to vector<16x128xf32>
    %72 = arith.mulf %66, %71 : vector<16x128xf32>
    %cst_38 = arith.constant 0.000000e+00 : f32
    %73 = vector.broadcast %cst_38 : f32 to vector<16x128xf32>
    %74 = arith.cmpf oge, %72, %73 : vector<16x128xf32>
    %cst_39 = arith.constant 2.500000e-01 : f32
    %75 = vector.broadcast %cst_39 : f32 to vector<16x128xf32>
    %76 = arith.mulf %75, %72 : vector<16x128xf32>
    %77 = arith.select %74, %72, %76 : vector<16x128xi1>, vector<16x128xf32>
    %78 = vector.shape_cast %77 : vector<16x128xf32> to vector<1x16x128xf32>
    %cst_40 = arith.constant dense<0.000000e+00> : vector<1xf32>
    %79 = vector.multi_reduction <add>, %78, %cst_40 [1, 2] : vector<1x16x128xf32> to vector<1xf32>
    %80 = vector.shape_cast %79 : vector<1xf32> to vector<1x1x1xf32>
    %81 = vector.extract %80[0, 0, 0] : f32 from vector<1x1x1xf32>
    %cst_41 = arith.constant 0.0036764706 : f32
    %82 = arith.mulf %81, %cst_41 : f32
    %83 = arith.mulf %77, %77 : vector<16x128xf32>
    %84 = vector.shape_cast %83 : vector<16x128xf32> to vector<1x16x128xf32>
    %cst_42 = arith.constant dense<0.000000e+00> : vector<1xf32>
    %85 = vector.multi_reduction <add>, %84, %cst_42 [1, 2] : vector<1x16x128xf32> to vector<1xf32>
    %86 = vector.shape_cast %85 : vector<1xf32> to vector<1x1x1xf32>
    %87 = vector.extract %86[0, 0, 0] : f32 from vector<1x1x1xf32>
    %cst_43 = arith.constant 0.0036764706 : f32
    %88 = arith.mulf %87, %cst_43 : f32
    %89 = arith.mulf %82, %82 : f32
    %90 = arith.subf %88, %89 : f32
    %cst_44 = arith.constant 0.000000e+00 : f32
    %91 = arith.maximumf %90, %cst_44 : f32
    %92 = vector.broadcast %82 : f32 to vector<16x128xf32>
    %93 = arith.subf %77, %92 : vector<16x128xf32>
    %94 = vector.broadcast %68 : vector<16x1xf32> to vector<16x128xf32>
    %95 = arith.mulf %94, %93 : vector<16x128xf32>
    %cst_45 = arith.constant 9.99999993E-9 : f32
    %96 = arith.addf %91, %cst_45 : f32
    %97 = math.rsqrt %96 : f32
    %98 = vector.broadcast %97 : f32 to vector<16x128xf32>
    %99 = arith.mulf %95, %98 : vector<16x128xf32>
    %100 = vector.broadcast %70 : vector<16x1xf32> to vector<16x128xf32>
    %101 = arith.addf %99, %100 : vector<16x128xf32>
    %102 = vector.broadcast %8 : vector<1x128xf32> to vector<16x128xf32>
    %103 = arith.mulf %101, %102 : vector<16x128xf32>
    %c0_46 = arith.constant 0 : index
    %c0_47 = arith.constant 0 : index
    %c0_48 = arith.constant 0 : index
    %104 = vector.load %arg9[%c0_46, %c0_47, %c0_48] : memref<1x8x16xbf16, #tpu.memory_space<vmem>>, vector<1x8x16xbf16>
    %105 = vector.shape_cast %104 : vector<1x8x16xbf16> to vector<8x16xbf16>
    %106 = arith.truncf %103 : vector<16x128xf32> to vector<16x128xbf16>
    %cst_49 = arith.constant dense<0.000000e+00> : vector<8x128xf32>
    %107 = tpu.matmul %105, %106, %cst_49 {dimension_numbers = #tpu.dot_dimension_numbers<[1], [0], [0], [1], [0, 0, 1, 1], [], []>} : vector<8x16xbf16>, vector<16x128xbf16>, vector<8x128xf32> -> vector<8x128xf32>
    %108 = arith.addf %107, %3 : vector<8x128xf32>
    %c0_50 = arith.constant 0 : index
    %c0_51 = arith.constant 0 : index
    %109 = vector.load %arg11[%c0_50, %c0_51] : memref<8x128xf32, #tpu.memory_space<vmem>>, vector<8x128xf32>
    tpu.vector_store %arg11[%c0_50, %c0_51], %108 {strides = array<i32>} : memref<8x128xf32, #tpu.memory_space<vmem>>, vector<8x128xf32>,
    %c3_i32 = arith.constant 3 : i32
    %110 = arith.cmpi eq, %arg1, %c3_i32 : i32
    %111 = arith.extui %110 : i1 to i32
    %c0_i32_52 = arith.constant 0 : i32
    %112 = arith.cmpi ne, %111, %c0_i32_52 : i32
    scf.if %112 {
      %113 = vector.shape_cast %108 : vector<8x128xf32> to vector<1x8x128xf32>
      %c0_53 = arith.constant 0 : index
      %c0_54 = arith.constant 0 : index
      %c0_55 = arith.constant 0 : index
      %114 = vector.load %arg10[%c0_53, %c0_54, %c0_55] : memref<1x8x128xf32, #tpu.memory_space<vmem>>, vector<1x8x128xf32>
      tpu.vector_store %arg10[%c0_53, %c0_54, %c0_55], %113 {strides = array<i32>} : memref<1x8x128xf32, #tpu.memory_space<vmem>>, vector<1x8x128xf32>,
    } else {
    }
    return
  }
  func.func @transform_0(%arg0: i32, %arg1: i32) -> (i32, i32, i32) {
    %c0_i32 = arith.constant 0 : i32
    %c0_i32_0 = arith.constant 0 : i32
    %c0_i32_1 = arith.constant 0 : i32
    return %arg0, %c0_i32, %c0_i32_0 : i32, i32, i32
  }
  func.func @transform_1(%arg0: i32, %arg1: i32) -> (i32, i32, i32) {
    %c0_i32 = arith.constant 0 : i32
    %c0_i32_0 = arith.constant 0 : i32
    %c0_i32_1 = arith.constant 0 : i32
    return %arg1, %c0_i32, %c0_i32_0 : i32, i32, i32
  }
  func.func @transform_2(%arg0: i32, %arg1: i32) -> (i32, i32, i32) {
    %c0_i32 = arith.constant 0 : i32
    %c0_i32_0 = arith.constant 0 : i32
    %c0_i32_1 = arith.constant 0 : i32
    return %arg1, %c0_i32, %c0_i32_0 : i32, i32, i32
  }
  func.func @transform_3(%arg0: i32, %arg1: i32) -> (i32, i32, i32) {
    %c0_i32 = arith.constant 0 : i32
    %c0_i32_0 = arith.constant 0 : i32
    %c0_i32_1 = arith.constant 0 : i32
    return %arg1, %c0_i32, %c0_i32_0 : i32, i32, i32
  }
  func.func @transform_4(%arg0: i32, %arg1: i32) -> (i32, i32, i32) {
    %c0_i32 = arith.constant 0 : i32
    %c0_i32_0 = arith.constant 0 : i32
    %c0_i32_1 = arith.constant 0 : i32
    return %arg1, %c0_i32, %c0_i32_0 : i32, i32, i32
  }
  func.func @transform_5(%arg0: i32, %arg1: i32) -> (i32, i32, i32) {
    %c0_i32 = arith.constant 0 : i32
    %c0_i32_0 = arith.constant 0 : i32
    %c0_i32_1 = arith.constant 0 : i32
    return %arg1, %c0_i32, %c0_i32_0 : i32, i32, i32
  }
  func.func @transform_6(%arg0: i32, %arg1: i32) -> (i32, i32, i32) {
    %c0_i32 = arith.constant 0 : i32
    %c0_i32_0 = arith.constant 0 : i32
    %c0_i32_1 = arith.constant 0 : i32
    return %arg1, %c0_i32, %c0_i32_0 : i32, i32, i32
  }
  func.func @transform_7(%arg0: i32, %arg1: i32) -> (i32, i32, i32) {
    %c0_i32 = arith.constant 0 : i32
    %c0_i32_0 = arith.constant 0 : i32
    %c0_i32_1 = arith.constant 0 : i32
    return %arg1, %c0_i32, %c0_i32_0 : i32, i32, i32
  }
  func.func @transform_8(%arg0: i32, %arg1: i32) -> (i32, i32, i32) {
    %c0_i32 = arith.constant 0 : i32
    %c0_i32_0 = arith.constant 0 : i32
    %c0_i32_1 = arith.constant 0 : i32
    return %arg0, %c0_i32, %c0_i32_0 : i32, i32, i32
  }
}

</mosaic_0001>

<bundles_post_ra>
// kernel: conv_tasnet_forward.5
= control target key start
LH: loop header
LB: loop body
LE: loop exit
PB: predicated region body
PF: predicated region fallthrough
CT: control target
= control target key end

     0   :  { %s798_s21 = smov 0   ;;  %s858_s0 = inlined_call_operand.vmem [shape: f32[2,8,128], index: 0, kind: input, shape index: {}]   ;;  %s859_s1 = inlined_call_operand.vmem [shape: bf16[18,8], index: 1, kind: input, shape index: {}]   ;;  %s860_s2 = inlined_call_operand.vmem [shape: f32[2,9,128], index: 2, kind: input, shape index: {}]   ;;  %s861_s3 = inlined_call_operand.vmem [shape: f32[2,9,128], index: 3, kind: input, shape index: {}]   ;;  %s862_s4 = inlined_call_operand.vmem [shape: bf16[4,9], index: 4, kind: input, shape index: {}]   ;;  %s863_s5 = inlined_call_operand.vmem [shape: bf16[4,9], index: 5, kind: input, shape index: {}]   ;;  %s864_s6 = inlined_call_operand.vmem [shape: f32[2,2,4,128], index: 6, kind: output, shape index: {}]  }
   0x1 LB: > { %s663_s22 = sadd.s32 4294967295, %s758_s21   ;;  %p667_p0 = scmp.ge.s32.totalorder %s758_s21, 1  ;;  %s758_s21 = sphi %s798_s21, %s16_s21  }
   0x2   : > { %p231_p1 = scmp.lt.s32.totalorder %s758_s21, 3 }
   0x4   : > { %p232_p2 = pnand %p667_p0, %p231_p1 }
   0x5   : > { %p270_p3 = scmp.lt.s32.totalorder (!%p232_p2), %s663_s22, 1  ;;  %v750_v0 = vld [vmem:[%s859_s1] sm:$0xff] (!%p232_p2)   ;;  %vm303_vm0 = vcmask (!%p232_p2), 64512   ;;  %vm310_vm1 = vcmask (!%p232_p2), 1043456   ;;  %v760_v5 = vmov (!%p232_p2), 0.0   ;;  %vm761_vm2 = vmmov (!%p232_p2), 0  }
   0x6   : > { %235 = sbr.rel (%p232_p2) target bundleno = 479 (0x1df), region = 44  ;;  %702 = vmatprep.mubr.msk.bf16.mxu0 (!%p232_p2), %vm303_vm0, %v750_v0  ;;  %v751_v4 = vld [vmem:[%s859_s1 + $0x8] ss:$0 sps:$4 sm:$0x11] (!%p232_p2)   ;;  %706 = vmatprep.subr.bf16.mxu1 (!%p232_p2), %v760_v5  ;;  %vm381_vm3 = vcmask (!%p232_p2), 1044480   ;;  %v762_v16 = vmov (!%p232_p2), 65535  }
   0x7   : > { %708 = vmatprep.mubr.msk.bf16.mxu1 (!%p232_p2), %vm761_vm2, %v760_v5  ;;  %v382_v17 = vsel (!%p232_p2), %vm310_vm1, 4294967295, %v762_v16  ;;  %vm476_vm4 = vcmask (!%p232_p2), 1046528   ;;  %v376_v37 = vld [vmem:[%s863_s5] sm:$0x3] (!%p232_p2)  ;;  %vm377_vm5 = vcmask (!%p232_p2), 72704  }
   0x8   : > { %v383_v25 = vsel (!%p232_p2), %vm381_vm3, %v382_v17, 0  ;;  %v489_v40 = vld [vmem:[%s863_s5] sm:$0x3] (!%p232_p2) }
   0x9   : > { %v375_v41 = vld [vmem:[%s862_s4] sm:$0x3] (!%p232_p2) }
   0xa   : > { %v488_v42 = vld [vmem:[%s862_s4] sm:$0x3] (!%p232_p2) }
   0xd   : > { %s866_s22 = smov (!%p270_p3, %s663_s22), 1 }
   0xe   : > { %s668_s25 = sshll.u32 %s866_s22, 3  ;;  %s686_s7 = sshll.u32 %s866_s22, 4 }
   0xf   : > { %s273_s28 = scalar_lea.vmem %s858_s0, %s668_s25  ;;  %s278_s10 = scalar_lea.vmem %s860_s2, %s686_s7 }
  0x10   : > { %v290_v1 = vld [vmem:[%s273_s28] sm:$0xff]  ;;  %s283_s13 = scalar_lea.vmem %s861_s3, %s686_s7  ;;  %v366_v12 = vld [vmem:[%s278_s10 + $0x8] sm:$0x1]  ;;  %s288_s27 = scalar_lea.vmem %s864_s6, %s668_s25 }
  0x11   : > { %v291_v2 = vpack.c.bf16 %v290_v1, %v290_v1  ;;  %v365_v10 = vld [vmem:[%s278_s10] sm:$0xff]  ;;  %v368_v14 = vld [vmem:[%s283_s13 + $0x8] sm:$0x1] }
  0x12   : > { %v367_v13 = vld [vmem:[%s283_s13] sm:$0xff] }
  0x13   : > { %738 = vmatprep.subr.msk.bf16.mxu0 %vm310_vm1, %v291_v2  ;;  %v312_v3 = vsel %vm310_vm1, %v291_v2, 0 }
  0x14   : > { %701 = vmatpush3.bf16.msra.mxu0 %v312_v3 }
  0x15   : > { %718 = vmatprep.subr.bf16.mxu0 %v760_v5 }
  0x17   : > { %703 = vmatmul.mubr.msk.bf16.vlgmr.msra.gmra.mrb[0].mxu0 %vm303_vm0, %v751_v4 }
  0x18   : > { %720 = vmatprep.mubr.msk.bf16.mxu0 %vm761_vm2, %v760_v5 }
  0xea   : > { %v704_v6 = vpop.f32.mrb[0].mxu0 }
  0xeb   : > { %v364_v7 = vmax.f32 %v704_v6, 0.0  ;;  %v348_v8 = vpop.f32.mrb[1].mxu0 }
  0xec   : > { %v362_v9 = vmax.f32 %v348_v8, 0.0  ;;  %v705_v11 = vpop.f32.mrb[2].mxu0 }
  0xed   : > { %v351_v15 = vpop.f32.mrb[3].mxu0  ;;  %v478_v19 = vrot.slane %v364_v7, 1 }
  0xee   : > { %v363_v18 = vmax.f32 %v351_v15, 0.0  ;;  %v369_v20 = vmul.f32 %v365_v10, %v362_v9  ;;  %v372_v21 = vmul.f32 %v367_v13, %v362_v9 }
  0xef   : > { %v483_v29 = vmul.f32 %v478_v19, %v366_v12  ;;  %v486_v30 = vmul.f32 %v478_v19, %v368_v14 }
  0xf0   : > { %v370_v22 = vmul.f32 %v366_v12, %v363_v18  ;;  %v373_v23 = vmul.f32 %v368_v14, %v363_v18  ;;  %v477_v24 = vrot.slane %v363_v18, 1 }
  0xf2   : > { %v371_v26 = vpack.c.bf16 %v370_v22, %v369_v20  ;;  %v479_v27 = vsel %vm476_vm4, %v477_v24, %v478_v19  ;;  %v374_v28 = vpack.c.bf16 %v373_v23, %v372_v21 }
  0xf3   : > { %v482_v31 = vmul.f32 %v479_v27, %v365_v10  ;;  %v485_v32 = vmul.f32 %v479_v27, %v367_v13 }
  0xf4   : > { %v385_v33 = vand.u32 %v383_v25, %v374_v28  ;;  %v431_v34 = vand.u32 %v383_v25, %v371_v26 }
  0xf5   : > { %v487_v35 = vpack.c.bf16 %v486_v30, %v485_v32  ;;  %v484_v36 = vpack.c.bf16 %v483_v29, %v482_v31 }
  0xf6   : > { %707 = vmatpush3.bf16.msra.mxu1 %v385_v33 }
  0xf7   : > { %712 = vmatprep.subr.bf16.mxu1 %v760_v5  ;;  %v494_v38 = vand.u32 %v487_v35, %v383_v25  ;;  %v540_v39 = vand.u32 %v484_v36, %v383_v25 }
  0xf9   : > { %709 = vmatmul.mubr.msk.bf16.vlgmr.msra.gmra.mrb[0].mxu1 %vm377_vm5, %v376_v37  ;;  %719 = vmatpush3.bf16.msra.mxu0 %v494_v38 }
  0xfa   : > { %713 = vmatpush3.bf16.msra.mxu1 %v431_v34  ;;  %724 = vmatprep.subr.bf16.mxu0 %v760_v5 }
  0xfb   : > { %714 = vmatprep.mubr.msk.bf16.mxu1 %vm761_vm2, %v760_v5 }
  0xfc   : > { %721 = vmatmul.mubr.msk.bf16.vlgmr.msra.gmra.mrb[4].mxu0 %vm377_vm5, %v489_v40 }
  0xfd   : > { %725 = vmatpush3.bf16.msra.mxu0 %v540_v39  ;;  %726 = vmatprep.mubr.msk.bf16.mxu0 %vm761_vm2, %v760_v5 }
 0x105   : > { %715 = vmatmul.mubr.msk.bf16.vlgmr.msra.gmra.mrb[0].mxu1 %vm377_vm5, %v375_v41 }
 0x108   : > { %727 = vmatmul.mubr.msk.bf16.vlgmr.msra.gmra.mrb[4].mxu0 %vm377_vm5, %v488_v42 }
 0x1d8   : > { %v467_v43 = vpop.f32.mrb[0].mxu1 }
 0x1d9   : > { %473 = vst [vmem:[%s288_s27] sm:$0xf] %v467_v43  ;;  %v716_v44 = vpop.f32.mrb[1].mxu1 }
 0x1da   : > { %v470_v45 = vpop.f32.mrb[2].mxu1 }
 0x1db   : > { %v717_v46 = vpop.f32.mrb[3].mxu1  ;;  %v576_v47 = vpop.f32.mrb[4].mxu0 }
 0x1dc   : > { %683 = vst [vmem:[%s288_s27 + $0x4] sm:$0xf] %v576_v47  ;;  %v728_v48 = vpop.f32.mrb[5].mxu0 }
 0x1dd   : > { %v579_v49 = vpop.f32.mrb[6].mxu0 }
 0x1de   : > { %v729_v50 = vpop.f32.mrb[7].mxu0 }
 0x1df PF: > { %s16_s21 = sadd.s32 1, %s758_s21  }
 0x1e0   : > { %p13_p4 = scmp.ge.s32.totalorder %s16_s21, 4  }
 0x1e2   :  { %15 = sbr.rel (!%p13_p4) target bundleno = 1 (0x1), region = 81 }

// kernel: conv_tasnet_forward.3
= control target key start
LH: loop header
LB: loop body
LE: loop exit
PB: predicated region body
PF: predicated region fallthrough
CT: control target
= control target key end

     0   :  { %s813_s27 = smov 0   ;;  %s874_s0 = inlined_call_operand.vmem [shape: bf16[2,4,128], index: 0, kind: input, shape index: {}]   ;;  %s875_s1 = inlined_call_operand.vmem [shape: bf16[9,4], index: 1, kind: input, shape index: {}]   ;;  %s876_s2 = inlined_call_operand.vmem [shape: bf16[9,4], index: 2, kind: input, shape index: {}]   ;;  %s877_s3 = inlined_call_operand.vmem [shape: f32[9,1], index: 3, kind: input, shape index: {}]   ;;  %s878_s4 = inlined_call_operand.vmem [shape: f32[9,1], index: 4, kind: input, shape index: {}]   ;;  %s879_s5 = inlined_call_operand.vmem [shape: bf16[8,9], index: 5, kind: input, shape index: {}]   ;;  %s880_s6 = inlined_call_operand.vmem [shape: f32[2,9,128], index: 6, kind: output, shape index: {0}]   ;;  %s881_s7 = inlined_call_operand.vmem [shape: f32[2,9,128], index: 7, kind: output, shape index: {1}]   ;;  %s882_s8 = inlined_call_operand.vmem [shape: f32[2,8,128], index: 8, kind: output, shape index: {2}]  }
   0x1 LB: > { %s689_s28 = sadd.s32 4294967295, %s762_s27   ;;  %p693_p0 = scmp.ge.s32.totalorder %s762_s27, 1  ;;  %s762_s27 = sphi %s813_s27, %s19_s27  }
   0x2   : > { %p266_p1 = scmp.lt.s32.totalorder %s762_s27, 3 }
   0x4   : > { %p267_p2 = pnand %p693_p0, %p266_p1 }
   0x5   : > { %p308_p3 = scmp.lt.s32.totalorder (!%p267_p2), %s689_s28, 1  ;;  %v764_v0 = vmov (!%p267_p2), 0.0   ;;  %vm765_vm0 = vmmov (!%p267_p2), 0   ;;  %v477_v1 = vld [vmem:[%s877_s3] sm:$0xff] (!%p267_p2)  ;;  %v766_v2 = vmov (!%p267_p2), 0   ;;  %vm339_vm1 = vcmask (!%p267_p2), 1041408  }
   0x6   : > { %270 = sbr.rel (%p267_p2) target bundleno = 535 (0x217), region = 44  ;;  %716 = vmatprep.subr.bf16.mxu0 (!%p267_p2), %v764_v0  ;;  %722 = vmatprep.subr.bf16.mxu1 (!%p267_p2), %v764_v0  ;;  %v495_v3 = vld [vmem:[%s878_s4] sm:$0xff] (!%p267_p2)  ;;  %v478_v5 = vld [vmem:[%s877_s3 + $0x8] sm:$0x1] (!%p267_p2)  ;;  %vm335_vm2 = vcmask (!%p267_p2), 31744   ;;  %vm453_vm3 = vcmask (!%p267_p2), 1040384   ;;  %v509_v56 = vlaneseq (!%p267_p2) }
   0x7   : > { %718 = vmatprep.mubr.msk.bf16.mxu0 (!%p267_p2), %vm765_vm0, %v764_v0  ;;  %724 = vmatprep.mubr.msk.bf16.mxu1 (!%p267_p2), %vm765_vm0, %v764_v0  ;;  %v496_v6 = vld [vmem:[%s878_s4 + $0x8] sm:$0x1] (!%p267_p2)  ;;  %v748_v8 = vld [vmem:[%s875_s1] sm:$0x1f] (!%p267_p2)   ;;  %vm522_vm5 = vcmask (!%p267_p2), 1043456   ;;  %vm523_vm6 = vcmask (!%p267_p2), 1044480  }
   0x8   : > { %746 = vset.pattern.permute.xlu0 (!%p267_p2), %v766_v2  ;;  %747 = vset.pattern.permute.xlu1 (!%p267_p2), %v766_v2  ;;  %v749_v9 = vld [vmem:[%s876_s2] sm:$0x1f] (!%p267_p2)   ;;  %v510_v57 = vand.u32 (!%p267_p2), 127, %v509_v56  ;;  %vm518_vm7 = vcmask (!%p267_p2), 72704  }
   0x9   : > { %481 = vperm.xlu0 (!%p267_p2), %746, %v477_v1   ;;  %499 = vperm.xlu1 (!%p267_p2), %747, %v495_v3  }
   0xa   : > { %vm511_vm4 = vcmp.lt.s32.totalorder (!%p267_p2), %v510_v57, 17 }
   0xb   : > { %v704_v2 = vsel (!%p267_p2), %vm511_vm4, 1.0, %v764_v0 }
   0xd   : > { %s884_s28 = smov (!%p308_p3, %s689_s28), 1  ;;  %486 = vperm.xlu0 %746, %v478_v5   ;;  %504 = vperm.xlu1 %747, %v496_v6   ;;  %v767_v5 = vmov 65535  }
   0xe   : > { %s694_s11 = sshll.u32 %s884_s28, 1  ;;  %s708_s23 = sshll.u32 %s884_s28, 4  ;;  %v524_v6 = vsel %vm522_vm5, 4294967295, %v767_v5 }
   0xf   : > { %s311_s14 = scalar_lea.vmem %s874_s0, %s694_s11  ;;  %s316_s26 = scalar_lea.vmem %s880_s6, %s708_s23 }
  0x10   : > { %v327_v4 = vld [vmem:[%s311_s14] sm:$0x3]  ;;  %s321_s9 = scalar_lea.vmem %s881_s7, %s708_s23  ;;  %s699_s12 = sshll.u32 %s884_s28, 3 }
  0x11   : > { %v341_v7 = vsel %vm339_vm1, %v327_v4, 0  ;;  %s325_s15 = scalar_lea.vmem %s882_s8, %s699_s12 }
  0x12   : > { %717 = vmatpush3.bf16.msra.mxu0 %v341_v7  ;;  %723 = vmatpush3.bf16.msra.mxu1 %v341_v7 }
  0x13   : > { %728 = vmatprep.subr.bf16.mxu0 %v764_v0 }
  0x15   : > { %719 = vmatmul.mubr.msk.bf16.vlgmr.msra.gmra.mrb[0].mxu0 %vm335_vm2, %v748_v8  ;;  %725 = vmatmul.mubr.msk.bf16.vlgmr.msra.gmra.mrb[0].mxu1 %vm335_vm2, %v749_v9 }
  0x16   : > { %730 = vmatprep.mubr.msk.bf16.mxu0 %vm765_vm0, %v764_v0 }
  0x88   : > { %v482_v55 = vpop.permute.xlu0 %481  ;;  %v500_v59 = vpop.permute.xlu1 %499 }
  0x8c   : > { %v487_v58 = vpop.permute.xlu0 %486  ;;  %v505_v3 = vpop.permute.xlu1 %504 }
  0xe8   : > { %v377_v10 = vpop.f32.mrb[0].mxu0  ;;  %v428_v11 = vpop.f32.mrb[0].mxu1 }
  0xe9   : > { %435 = vst [vmem:[%s316_s26] sm:$0xff] %v377_v10  ;;  %v439_v12 = vmul.f32 %v377_v10, %v377_v10  ;;  %437 = vst [vmem:[%s321_s9] sm:$0xff] %v428_v11  ;;  %v441_v13 = vmul.f32 %v428_v11, %v428_v11  ;;  %v720_v14 = vpop.f32.mrb[1].mxu0  ;;  %v726_v15 = vpop.f32.mrb[1].mxu1  ;;  %v525_v10 = vsel %vm523_vm6, %v524_v6, 0 }
  0xea   : > { %v380_v16 = vpop.f32.mrb[2].mxu0  ;;  %v431_v17 = vpop.f32.mrb[2].mxu1 }
  0xeb   : > { %v443_v18 = vadd.f32 %v441_v13, %v439_v12  ;;  %436 = vst [vmem:[%s316_s26 + $0x8] sm:$0x1] %v380_v16  ;;  %v440_v19 = vmul.f32 %v380_v16, %v380_v16  ;;  %438 = vst [vmem:[%s321_s9 + $0x8] sm:$0x1] %v431_v17  ;;  %v442_v20 = vmul.f32 %v431_v17, %v431_v17  ;;  %v721_v21 = vpop.f32.mrb[3].mxu0  ;;  %v727_v22 = vpop.f32.mrb[3].mxu1 }
  0xec   : > { %v516_v13 = vld [vmem:[%s879_s5] sm:$0xf] }
  0xed   : > { %v445_v23 = vmax.f32 %v443_v18, 1.4210855e-14  ;;  %v444_v24 = vadd.f32 %v442_v20, %v440_v19 }
  0xef   : > { %750 = vlog2.f32 %v445_v23  ;;  %v446_v25 = vmax.f32 %v444_v24, 1.4210855e-14 }
  0xf1   : > { %752 = vlog2.f32 %v446_v25 }
  0xf9   : > { %v751_v26 = vpop.eup %750 }
  0xfa   : > { %v448_v28 = vmul.f32 0.6931472, %v751_v26 }
  0xfb   : > { %v753_v27 = vpop.eup %752 }
  0xfc   : > { %v450_v29 = vmul.f32 0.6931472, %v753_v27  ;;  %v451_v31 = vmul.f32 0.5, %v448_v28 }
  0xfe   : > { %v452_v30 = vmul.f32 0.5, %v450_v29 }
 0x100   : > { %v454_v32 = vsel %vm453_vm3, %v452_v30, 0.0 }
 0x101   : > { %v455_v33 = vadd.f32 %v454_v32, %v451_v31 }
 0x103   : > { %v456_v34 = vrot.slane %v455_v33, 4 }
 0x105   : > { %v457_v35 = vadd.f32 %v456_v34, %v455_v33 }
 0x107   : > { %v458_v36 = vrot.slane %v457_v35, 2 }
 0x109   : > { %v459_v37 = vadd.f32 %v458_v36, %v457_v35 }
 0x10b   : > { %v460_v38 = vrot.slane %v459_v37, 1 }
 0x10d   : > { %v461_v39 = vadd.f32 %v460_v38, %v459_v37 }
 0x10f   : > { %v463_v40 = vmul.f32 0.11111111, %v461_v39 }
 0x111   : > { %v464_v41 = vsub.f32 %v451_v31, %v463_v40  ;;  %v465_v42 = vsub.f32 %v452_v30, %v463_v40 }
 0x113   : > { %v466_v43 = vmul.f32 %v464_v41, %v464_v41  ;;  %v467_v44 = vmul.f32 %v465_v42, %v465_v42  ;;  %v489_v60 = vmul.f32 %v482_v55, %v464_v41  ;;  %v490_v61 = vmul.f32 %v487_v58, %v465_v42 }
 0x115   : > { %v468_v45 = vsel %vm453_vm3, %v467_v44, 0.0 }
 0x116   : > { %v469_v46 = vadd.f32 %v468_v45, %v466_v43 }
 0x118   : > { %v470_v47 = vrot.slane %v469_v46, 4 }
 0x11a   : > { %v471_v48 = vadd.f32 %v470_v47, %v469_v46 }
 0x11c   : > { %v472_v49 = vrot.slane %v471_v48, 2 }
 0x11e   : > { %v473_v50 = vadd.f32 %v472_v49, %v471_v48 }
 0x120   : > { %v474_v51 = vrot.slane %v473_v50, 1 }
 0x122   : > { %v475_v52 = vadd.f32 %v474_v51, %v473_v50 }
 0x124   : > { %v476_v53 = vmul.f32 0.11111111, %v475_v52 }
 0x126   : > { %v491_v54 = vadd.f32 1e-08, %v476_v53 }
 0x128   : > { %754 = vrsqrt.f32 %v491_v54 }
 0x132   : > { %v755_v62 = vpop.eup %754 }
 0x133   : > { %v493_v63 = vmul.f32 %v755_v62, %v489_v60  ;;  %v494_v1 = vmul.f32 %v755_v62, %v490_v61 }
 0x135   : > { %v507_v4 = vadd.f32 %v500_v59, %v493_v63  ;;  %v508_v7 = vadd.f32 %v505_v3, %v494_v1 }
 0x137   : > { %v514_v8 = vmul.f32 %v704_v2, %v507_v4  ;;  %v515_v9 = vmul.f32 %v704_v2, %v508_v7 }
 0x139   : > { %v517_v11 = vpack.c.bf16 %v515_v9, %v514_v8 }
 0x13b   : > { %v527_v12 = vand.u32 %v525_v10, %v517_v11 }
 0x13d   : > { %729 = vmatpush3.bf16.msra.mxu0 %v527_v12 }
 0x140   : > { %731 = vmatmul.mubr.msk.bf16.vlgmr.msra.gmra.mrb[4].mxu0 %vm518_vm7, %v516_v13 }
 0x213   : > { %v563_v0 = vpop.f32.mrb[4].mxu0 }
 0x214   : > { %569 = vst [vmem:[%s325_s15] sm:$0xff] %v563_v0  ;;  %v732_v14 = vpop.f32.mrb[5].mxu0 }
 0x215   : > { %v566_v15 = vpop.f32.mrb[6].mxu0 }
 0x216   : > { %v733_v16 = vpop.f32.mrb[7].mxu0 }
 0x217 PF: > { %s19_s27 = sadd.s32 1, %s762_s27  }
 0x218   : > { %p16_p4 = scmp.ge.s32.totalorder %s19_s27, 4  }
 0x21a   :  { %18 = sbr.rel (!%p16_p4) target bundleno = 1 (0x1), region = 98 }

// kernel: conv_tasnet_forward.4
= control target key start
LH: loop header
LB: loop body
LE: loop exit
PB: predicated region body
PF: predicated region fallthrough
CT: control target
= control target key end

     0   :  { %s1225_s27 = smov 0   ;;  %s1227_s28 = smov 0   ;;  %s1390_s0 = inlined_call_operand.vmem [shape: f32[2,8,128], index: 0, kind: input, shape index: {}]   ;;  %s1391_s1 = inlined_call_operand.vmem [shape: bf16[4,16,8], index: 1, kind: input, shape index: {}]   ;;  %s1392_s2 = inlined_call_operand.vmem [shape: f32[4,16,1], index: 2, kind: input, shape index: {}]   ;;  %s1393_s3 = inlined_call_operand.vmem [shape: f32[4,16,1], index: 3, kind: input, shape index: {}]   ;;  %s1394_s4 = inlined_call_operand.vmem [shape: f32[4,16,3], index: 4, kind: input, shape index: {}]   ;;  %s1395_s5 = inlined_call_operand.vmem [shape: f32[4,16,1], index: 5, kind: input, shape index: {}]   ;;  %s1396_s6 = inlined_call_operand.vmem [shape: f32[4,16,1], index: 6, kind: input, shape index: {}]   ;;  %s1397_s7 = inlined_call_operand.vmem [shape: bf16[4,8,16], index: 7, kind: input, shape index: {}]   ;;  %s1398_s8 = inlined_call_operand.vmem [shape: f32[2,8,128], index: 8, kind: output, shape index: {}]  }
   0x1   :  { %1399 = sst [smem:[#allocation6_spill]] %s1390_s0  ;;  %s1229_s29 = smov 0  }
   0x2   :  { %1400 = sst [smem:[#allocation7_spill]] %s1391_s1  ;;  %s1231_s30 = smov 0  }
   0x3   :  { %1401 = sst [smem:[#allocation8_spill]] %s1392_s2  ;;  %s1233_s9 = smov 0  }
   0x4 LB: > { %s27_s10 = sadd.s32 1, %s1156_s29  ;;  %s30_s11 = sadd.s32 1, %s1160_s30  ;;  %s1164_s9 = sphi %s1233_s9, %s18_s9   ;;  %s1160_s30 = sphi %s1231_s30, %s1412_s30   ;;  %s1156_s29 = sphi %s1229_s29, %s1411_s29   ;;  %s1152_s28 = sphi %s1227_s28, %s1410_s28   ;;  %s1148_s27 = sphi %s1225_s27, %s1409_s27  }
   0x5   : > { %p28_p0 = scmp.ge.s32.totalorder %s27_s10, 4  ;;  %p992_p1 = scmp.ge.s32.totalorder %s1164_s9, 1 }
   0x6   : > { %p342_p2 = scmp.lt.s32.totalorder %s1164_s9, 9 }
   0x7   : > { %s1414_s10 = smov (%p28_p0, %s27_s10), 0  ;;  %s1416_s11 = smov (!%p28_p0, %s30_s11), %s1160_s30 }
   0x8   : > { %1402 = sst [smem:[#allocation4_spill]] %s1414_s10  ;;  %p343_p3 = pnand %p992_p1, %p342_p2 }
   0x9   : > { %p32_p4 = scmp.ge.s32.totalorder %s1416_s11, 2  ;;  %p408_p5 = scmp.lt.s32.totalorder (!%p343_p3), %s1152_s28, 1 }
   0xa   : > { %346 = sbr.rel (%p343_p3) target bundleno = 1334 (0x536), region = 52  ;;  %p412_p6 = scmp.lt.s32.totalorder (!%p343_p3), %s1148_s27, 3 }
   0xb   : > { %s1418_s11 = smov (%p32_p4, %s1416_s11), 0  ;;  %s1404_s0 = sld [smem:[#allocation6_spill]] (!%p343_p3) }
   0xc   : > { %1403 = sst [smem:[#allocation5_spill]] %s1418_s11  ;;  %s1405_s1 = sld [smem:[#allocation7_spill]] (!%p343_p3) }
   0xd   : > { %s1406_s2 = sld [smem:[#allocation8_spill]] (!%p343_p3)  ;;  %p1008_p7 = scmp.ne.s32.totalorder (!%p343_p3), %s1148_s27, 0 }
  0x11   : > { %s1420_s28 = smov (!%p408_p5, %s1152_s28), 1 }
  0x12   : > { %s413_s12 = scalar_select %p412_p6, %s1148_s27, 3 }
  0x13   : > { %s993_s13 = sshll.u32 %s1420_s28, 3  ;;  %454 = sbr.rel (%p1008_p7) target bundleno = 26 (0x1a), region = 56 }
  0x14   : > { %s411_s16 = scalar_lea.vmem %s1404_s0, %s993_s13  ;;  %s1021_s17 = sshll.u32 %s413_s12, 3 }
  0x15   : > { %s416_s20 = scalar_lea.vmem %s1405_s1, %s1021_s17  ;;  %s1022_s21 = sshll.u32 %s413_s12, 4  ;;  %v455_v0 = vld [vmem:[%s411_s16] sm:$0xff] (!%p1008_p7) }
  0x16   : > { %s421_s24 = scalar_lea.vmem %s1406_s2, %s1022_s21  ;;  %s1271_s11 = scalar_lea.vmem %s1393_s3, %s1022_s21  ;;  %456 = vst [vmem:[#allocation2] sm:$0xff] (!%p1008_p7), %v455_v0 }
  0x17   : > { %s1276_s14 = scalar_lea.vmem %s1394_s4, %s1022_s21  ;;  %s1281_s18 = scalar_lea.vmem %s1395_s5, %s1022_s21 }
  0x18   : > { %s1286_s22 = scalar_lea.vmem %s1396_s6, %s1022_s21  ;;  %s1006_s23 = sshll.u32 %s413_s12, 2 }
  0x19   : > { %s1291_s26 = scalar_lea.vmem %s1397_s7, %s1006_s23  ;;  %s1296_s28 = scalar_lea.vmem %s1398_s8, %s993_s13 }
  0x1a PF: > { %vm475_vm0 = vcmask 1043456   ;;  %v1166_v2 = vmov 0.0   ;;  %vm1167_vm1 = vmmov 0   ;;  %v1111_v5 = vld [vmem:[%s416_s20] sm:$0xff]   ;;  %vm471_vm2 = vcmask 64512   ;;  %v521_v8 = vld [vmem:[%s421_s24 + $0x8] sm:$0xff] }
  0x1b   : > { %1031 = vmatprep.subr.bf16.mxu0 %v1166_v2  ;;  %1033 = vmatprep.mubr.msk.bf16.mxu0 %vm1167_vm1, %v1166_v2  ;;  %v520_v6 = vld [vmem:[%s421_s24] sm:$0xff]  ;;  %v1168_v7 = vmov 0   ;;  %v523_v21 = vld [vmem:[%s1271_s11 + $0x8] sm:$0xff]  ;;  %s596_s0 = ssub.s32 0, %s1148_s27  ;;  %p595_p8 = scmp.lt.s32.totalorder %s1148_s27, 0  ;;  %v458_v42 = vlaneseq }
  0x1c   : > { %1109 = vset.pattern.permute.xlu1 %v1168_v7  ;;  %1110 = vset.pattern.permute.xlu0 %v1168_v7  ;;  %v522_v22 = vld [vmem:[%s1271_s11] sm:$0xff]  ;;  %s1012_s1 = smin.u32 %s1148_s27, %s596_s0  ;;  %v1317_v37 = vld [vmem:[%s1276_s14 + $0x8] sm:$0xff]  ;;  %s1169_s17 = smov 0.0  }
  0x1d   : > { %v1299_v1 = vld [vmem:[#allocation2] sm:$0xff]  ;;  %562 = vperm.xlu1 %1109, %v520_v6   ;;  %s598_s2 = sand.u32 1, %s1012_s1   ;;  %v459_v46 = vand.u32 127, %v458_v42 }
  0x1e   : > { %v465_v3 = vpack.c.bf16 %v1299_v1, %v1299_v1  ;;  %s599_s12 = ssub.s32 0, %s598_s2  ;;  %v1314_v36 = vld [vmem:[%s1276_s14] sm:$0xff] }
  0x1f   : > { %s1422_s12 = smov (!%p595_p8, %s599_s12), %s598_s2  ;;  %vm460_vm5 = vcmp.lt.s32.totalorder %v459_v46, 17 }
  0x20   : > { %v477_v4 = vsel %vm475_vm0, %v465_v3, 0  ;;  %p1014_p9 = scmp.lt.s32.totalorder %s1422_s12, 0  ;;  %s605_s11 = sadd.s32 2, %s1422_s12  ;;  %v1323_v55 = vsel %vm460_vm5, 1.0, %v1166_v2 }
  0x21   : > { %1032 = vmatpush3.bf16.msra.mxu0 %v477_v4  ;;  %567 = vperm.xlu1 %1109, %v521_v8  }
  0x22   : > { %s1424_s11 = smov (!%p1014_p9, %s605_s11), %s1422_s12 }
  0x23   : > { %p1015_p10 = scmp.ne.s32.totalorder %s1424_s11, 0 }
  0x24   : > { %1034 = vmatmul.mubr.msk.bf16.vlgmr.msra.gmra.mrb[0].mxu0 %vm471_vm2, %v1111_v5  ;;  %v1170_v60 = vmov (!%p1015_p10), 1   ;;  %v1171_v61 = vmov (!%p1015_p10), 0   ;;  %v1172_v62 = vmov (!%p1015_p10), 2   ;;  %s1173_s25 = smov (!%p1015_p10), 1   ;;  %s1174_s10 = smov (!%p1015_p10), 127  }
  0x25   : > { %586 = vperm.xlu1 %1109, %v523_v21  }
  0x29   : > { %1115 = vset.pattern.permute.xlu1 (!%p1015_p10), %v1170_v60 }
  0x2a   : > { %630 = vperm.xlu1 (!%p1015_p10), %1115, %v1314_v36  }
  0x2e   : > { %634 = vperm.xlu1 (!%p1015_p10), %1115, %v1317_v37  }
  0x32   : > { %1117 = vset.pattern.permute.xlu1 (!%p1015_p10), %v1172_v62 }
  0x33   : > { %650 = vperm.xlu1 (!%p1015_p10), %1117, %v1317_v37  }
  0x9c   : > { %v563_v41 = vpop.permute.xlu1 %562 }
  0xa0   : > { %v568_v47 = vpop.permute.xlu1 %567 }
  0xa4   : > { %v587_v54 = vpop.permute.xlu1 %586 }
  0xa9   : > { %v631_v63 = vpop.permute.xlu1 (!%p1015_p10), %630 }
  0xad   : > { %v635_v3 = vpop.permute.xlu1 (!%p1015_p10), %634 }
  0xb2   : > { %v651_v5 = vpop.permute.xlu1 (!%p1015_p10), %650 }
  0xf7   : > { %v513_v9 = vpop.f32.mrb[0].mxu0 }
  0xf8   : > { %v526_v10 = vmul.f32 0.25, %v513_v9  ;;  %v1035_v11 = vpop.f32.mrb[1].mxu0  ;;  %vm524_vm3 = vcmp.ge.f32.partialorder %v513_v9, 0.0 }
  0xf9   : > { %v516_v12 = vpop.f32.mrb[2].mxu0 }
  0xfa   : > { %vm525_vm4 = vcmp.ge.f32.partialorder %v516_v12, 0.0  ;;  %v527_v13 = vmul.f32 0.25, %v516_v12  ;;  %v1036_v14 = vpop.f32.mrb[3].mxu0  ;;  %v528_v15 = vsel %vm524_vm3, %v513_v9, %v526_v10 }
  0xfb   : > { %v541_v19 = vmul.f32 %v528_v15, %v528_v15 }
  0xfc   : > { %v529_v16 = vsel %vm525_vm4, %v516_v12, %v527_v13 }
  0xfd   : > { %v530_v17 = vadd.f32 %v529_v16, %v528_v15  ;;  %v542_v18 = vmul.f32 %v529_v16, %v529_v16 }
  0xff   : > { %531 = vadd.xlane.f32.xlu0 %v530_v17  ;;  %v543_v20 = vadd.f32 %v542_v18, %v541_v19 }
 0x103   : > { %544 = vadd.xlane.f32.xlu0 %v543_v20 }
 0x119   : > { %581 = vperm.xlu0 %1110, %v522_v22  }
 0x11d   : > { %1114 = vset.pattern.permute.xlu0 (!%p1015_p10), %v1171_v61 }
 0x11e   : > { %617 = vperm.xlu0 (!%p1015_p10), %1114, %v1314_v36  }
 0x122   : > { %622 = vperm.xlu0 (!%p1015_p10), %1114, %v1317_v37  }
 0x126   : > { %1116 = vset.pattern.permute.xlu0 (!%p1015_p10), %v1172_v62 }
 0x127   : > { %646 = vperm.xlu0 (!%p1015_p10), %1116, %v1314_v36  }
 0x18c   : > { %v532_v23 = vpop.xlane.xlu0 %531 }
 0x18d   : > { %v533_v24 = vrot.slane %v532_v23, 4 }
 0x18f   : > { %v534_v25 = vadd.f32 %v533_v24, %v532_v23 }
 0x190   : > { %v545_v26 = vpop.xlane.xlu0 %544 }
 0x191   : > { %v535_v27 = vrot.slane %v534_v25, 2  ;;  %v546_v28 = vrot.slane %v545_v26, 4 }
 0x193   : > { %v547_v29 = vadd.f32 %v546_v28, %v545_v26  ;;  %v536_v30 = vadd.f32 %v535_v27, %v534_v25 }
 0x195   : > { %v548_v31 = vrot.slane %v547_v29, 2  ;;  %v537_v32 = vrot.slane %v536_v30, 1 }
 0x197   : > { %v538_v33 = vadd.f32 %v537_v32, %v536_v30  ;;  %v549_v34 = vadd.f32 %v548_v31, %v547_v29 }
 0x198   : > { %v582_v51 = vpop.permute.xlu0 %581 }
 0x199   : > { %1043 = vpush %v538_v33  ;;  %v550_v35 = vrot.slane %v549_v34, 1 }
 0x19b   : > { %v551_v38 = vadd.f32 %v550_v35, %v549_v34 }
 0x19d   : > { %1045 = vpush %v551_v38  ;;  %v618_v0 = vpop.permute.xlu0 (!%p1015_p10), %617 }
 0x1a1   : > { %v623_v4 = vpop.permute.xlu0 (!%p1015_p10), %622 }
 0x1a6   : > { %v647_v6 = vpop.permute.xlu0 (!%p1015_p10), %646 }
 0x1ca   : > { %s1044_s13 = spop %1043 }
 0x1cb   : > { %s540_s16 = smul.f32 0.0036764706, %s1044_s13 }
 0x1cd   : > { %s554_s20 = smul.f32 %s540_s16, %s540_s16  ;;  %v557_v43 = vstv %s540_s16 }
 0x1ce   : > { %s1046_s21 = spop %1045  ;;  %v558_v44 = vsub.f32 %v528_v15, %v557_v43  ;;  %v559_v45 = vsub.f32 %v529_v16, %v557_v43 }
 0x1cf   : > { %s553_s24 = smul.f32 0.0036764706, %s1046_s21 }
 0x1d0   : > { %v570_v48 = vmul.f32 %v563_v41, %v558_v44  ;;  %v571_v49 = vmul.f32 %v568_v47, %v559_v45 }
 0x1d1   : > { %s555_s15 = ssub.f32 %s553_s24, %s554_s20 }
 0x1d3   : > { %s556_s19 = smax.f32 %s1169_s17, %s555_s15 }
 0x1d4   : > { %s572_s23 = sadd.f32 1e-08, %s556_s19 }
 0x1d6   : > { %v573_v39 = vstv %s572_s23 }
 0x1d7   : > { %1112 = vrsqrt.f32 %v573_v39 }
 0x1e1   : > { %v1113_v40 = vpop.eup %1112 }
 0x1e2   : > { %1047 = vpush %v1113_v40 }
 0x213   : > { %s1048_s14 = spop %1047  ;;  %610 = sbr.rel (%p1015_p10) target bundleno = 663 (0x297), region = 60 }
 0x214   : > { %v576_v50 = vstv %s1048_s14 }
 0x215   : > { %v577_v52 = vmul.f32 %v576_v50, %v570_v48  ;;  %v578_v53 = vmul.f32 %v576_v50, %v571_v49 }
 0x217   : > { %v590_v56 = vadd.f32 %v587_v54, %v578_v53  ;;  %v589_v57 = vadd.f32 %v582_v51, %v577_v52 }
 0x219   : > { %v1326_v58 = vmul.f32 %v1323_v55, %v590_v56  ;;  %v1329_v59 = vmul.f32 %v1323_v55, %v589_v57 }
 0x21b   : > { %613 = vrot.lane.b32.xlu0 %v1326_v58, %s1173_s25  ;;  %611 = vrot.lane.b32.xlu1 %v1329_v59, %s1173_s25  ;;  %v637_v12 = vmul.f32 %v631_v63, %v1329_v59  ;;  %v638_v13 = vmul.f32 %v635_v3, %v1326_v58 }
 0x21f   : > { %643 = vrot.lane.b32.xlu0 %v1326_v58, %s1174_s10  ;;  %641 = vrot.lane.b32.xlu1 %v1329_v59, %s1174_s10 }
 0x28d   : > { %v614_v8 = vpop.permute.xlu0 %613  ;;  %v612_v9 = vpop.permute.xlu1 %611 }
 0x28e   : > { %v626_v10 = vmul.f32 %v623_v4, %v614_v8  ;;  %v625_v11 = vmul.f32 %v618_v0, %v612_v9 }
 0x290   : > { %v640_v16 = vadd.f32 %v638_v13, %v626_v10  ;;  %v639_v17 = vadd.f32 %v637_v12, %v625_v11 }
 0x291   : > { %v644_v14 = vpop.permute.xlu0 %643  ;;  %v642_v15 = vpop.permute.xlu1 %641 }
 0x292   : > { %v654_v18 = vmul.f32 %v651_v5, %v644_v14  ;;  %v653_v19 = vmul.f32 %v647_v6, %v642_v15 }
 0x294   : > { %v656_v20 = vadd.f32 %v654_v18, %v640_v16  ;;  %v655_v21 = vadd.f32 %v653_v19, %v639_v17 }
 0x296   : > { %658 = vst [vmem:[#allocation3 + $0x8] sm:$0xff] %v656_v20  ;;  %657 = vst [vmem:[#allocation3] sm:$0xff] %v655_v21 }
 0x297 PF: > { %p1016_p11 = scmp.ne.s32.totalorder %s1424_s11, 1 }
 0x298   : > { %v1175_v22 = vmov (!%p1016_p11), 1   ;;  %v1176_v23 = vmov (!%p1016_p11), 0   ;;  %v1177_v24 = vmov (!%p1016_p11), 2   ;;  %s1178_s0 = smov (!%p1016_p11), 2   ;;  %s1179_s1 = smov (!%p1016_p11), 126  }
 0x299   : > { %662 = sbr.rel (%p1016_p11) target bundleno = 816 (0x330), region = 64  ;;  %1119 = vset.pattern.permute.xlu1 (!%p1016_p11), %v1175_v22  ;;  %1118 = vset.pattern.permute.xlu0 (!%p1016_p11), %v1176_v23 }
 0x29a   : > { %682 = vperm.xlu1 (!%p1016_p11), %1119, %v1314_v36   ;;  %669 = vperm.xlu0 (!%p1016_p11), %1118, %v1314_v36  }
 0x29e   : > { %686 = vperm.xlu1 (!%p1016_p11), %1119, %v1317_v37   ;;  %674 = vperm.xlu0 (!%p1016_p11), %1118, %v1317_v37  }
 0x2a2   : > { %1121 = vset.pattern.permute.xlu1 %v1177_v24  ;;  %1120 = vset.pattern.permute.xlu0 %v1177_v24 }
 0x2a3   : > { %702 = vperm.xlu1 %1121, %v1317_v37   ;;  %698 = vperm.xlu0 %1120, %v1314_v36  }
 0x2a7   : > { %665 = vrot.lane.b32.xlu0 %v1326_v58, %s1178_s0  ;;  %663 = vrot.lane.b32.xlu1 %v1329_v59, %s1178_s0 }
 0x2ab   : > { %695 = vrot.lane.b32.xlu0 %v1326_v58, %s1179_s1  ;;  %693 = vrot.lane.b32.xlu1 %v1329_v59, %s1179_s1 }
 0x319   : > { %v683_v25 = vpop.permute.xlu1 %682  ;;  %v670_v26 = vpop.permute.xlu0 %669 }
 0x31a   : > { %v689_v35 = vmul.f32 %v683_v25, %v1329_v59 }
 0x31d   : > { %v687_v27 = vpop.permute.xlu1 %686  ;;  %v675_v28 = vpop.permute.xlu0 %674 }
 0x31e   : > { %v690_v36 = vmul.f32 %v687_v27, %v1326_v58 }
 0x322   : > { %v703_v29 = vpop.permute.xlu1 %702  ;;  %v699_v30 = vpop.permute.xlu0 %698 }
 0x326   : > { %v666_v31 = vpop.permute.xlu0 %665  ;;  %v664_v32 = vpop.permute.xlu1 %663 }
 0x327   : > { %v678_v33 = vmul.f32 %v675_v28, %v666_v31  ;;  %v677_v34 = vmul.f32 %v670_v26, %v664_v32 }
 0x329   : > { %v692_v39 = vadd.f32 %v690_v36, %v678_v33  ;;  %v691_v40 = vadd.f32 %v689_v35, %v677_v34 }
 0x32a   : > { %v696_v37 = vpop.permute.xlu0 %695  ;;  %v694_v38 = vpop.permute.xlu1 %693 }
 0x32b   : > { %v706_v41 = vmul.f32 %v703_v29, %v696_v37  ;;  %v705_v42 = vmul.f32 %v699_v30, %v694_v38 }
 0x32d   : > { %v708_v43 = vadd.f32 %v706_v41, %v692_v39  ;;  %v707_v44 = vadd.f32 %v705_v42, %v691_v40 }
 0x32f   : > { %710 = vst [vmem:[#allocation3 + $0x8] sm:$0xff] %v708_v43  ;;  %709 = vst [vmem:[#allocation3] sm:$0xff] %v707_v44 }
 0x330 PF: > { %1122 = vset.pattern.permute.xlu1 %v1168_v7  ;;  %v713_v47 = vld [vmem:[%s1281_s18] sm:$0xff]  ;;  %1123 = vset.pattern.permute.xlu0 %v1168_v7  ;;  %v714_v50 = vld [vmem:[%s1281_s18 + $0x8] sm:$0xff]  ;;  %vm790_vm8 = vcmask 130048   ;;  %p1018_p12 = scmp.ne.s32.totalorder %s1148_s27, 3 }
 0x331   : > { %757 = vperm.xlu1 %1122, %v713_v47   ;;  %1037 = vmatprep.subr.bf16.mxu1 %v1166_v2  ;;  %v716_v59 = vld [vmem:[%s1286_s22 + $0x8] sm:$0xff]  ;;  %v715_v60 = vld [vmem:[%s1286_s22] sm:$0xff] }
 0x332   : > { %1039 = vmatprep.mubr.msk.bf16.mxu1 %vm1167_vm1, %v1166_v2  ;;  %v788_v32 = vld [vmem:[%s1291_s26] sm:$0xf] }
 0x335   : > { %762 = vperm.xlu1 %1122, %v714_v50  }
 0x336   : > { %v711_v45 = vld [vmem:[#allocation3] sm:$0xff]  ;;  %v712_v46 = vld [vmem:[#allocation3 + $0x8] sm:$0xff] }
 0x337   : > { %v717_v48 = vmul.f32 %v1323_v55, %v711_v45  ;;  %v718_v49 = vmul.f32 %v1323_v55, %v712_v46 }
 0x339   : > { %vm719_vm6 = vcmp.ge.f32.partialorder %v717_v48, 0.0  ;;  %vm720_vm7 = vcmp.ge.f32.partialorder %v718_v49, 0.0  ;;  %v721_v51 = vmul.f32 0.25, %v717_v48  ;;  %v722_v52 = vmul.f32 0.25, %v718_v49  ;;  %781 = vperm.xlu1 %1122, %v716_v59  }
 0x33b   : > { %v723_v53 = vsel %vm719_vm6, %v717_v48, %v721_v51  ;;  %v724_v54 = vsel %vm720_vm7, %v718_v49, %v722_v52 }
 0x33c   : > { %v725_v7 = vadd.f32 %v724_v54, %v723_v53  ;;  %v736_v56 = vmul.f32 %v723_v53, %v723_v53  ;;  %v737_v57 = vmul.f32 %v724_v54, %v724_v54 }
 0x33e   : > { %726 = vadd.xlane.f32.xlu0 %v725_v7  ;;  %v738_v58 = vadd.f32 %v737_v57, %v736_v56 }
 0x342   : > { %739 = vadd.xlane.f32.xlu0 %v738_v58 }
 0x358   : > { %776 = vperm.xlu0 %1123, %v715_v60  }
 0x3b0   : > { %v758_v15 = vpop.permute.xlu1 %757 }
 0x3b4   : > { %v763_v19 = vpop.permute.xlu1 %762 }
 0x3b8   : > { %v782_v26 = vpop.permute.xlu1 %781 }
 0x3cb   : > { %v727_v61 = vpop.xlane.xlu0 %726 }
 0x3cc   : > { %v728_v2 = vrot.slane %v727_v61, 4 }
 0x3ce   : > { %v729_v62 = vadd.f32 %v728_v2, %v727_v61 }
 0x3cf   : > { %v740_v63 = vpop.xlane.xlu0 %739 }
 0x3d0   : > { %v730_v0 = vrot.slane %v729_v62, 2  ;;  %v741_v3 = vrot.slane %v740_v63, 4 }
 0x3d2   : > { %v742_v4 = vadd.f32 %v741_v3, %v740_v63  ;;  %v731_v5 = vadd.f32 %v730_v0, %v729_v62 }
 0x3d4   : > { %v743_v6 = vrot.slane %v742_v4, 2  ;;  %v732_v8 = vrot.slane %v731_v5, 1 }
 0x3d6   : > { %v733_v9 = vadd.f32 %v732_v8, %v731_v5  ;;  %v744_v10 = vadd.f32 %v743_v6, %v742_v4 }
 0x3d7   : > { %v777_v23 = vpop.permute.xlu0 %776 }
 0x3d8   : > { %1049 = vpush %v733_v9  ;;  %v745_v11 = vrot.slane %v744_v10, 1 }
 0x3da   : > { %v746_v12 = vadd.f32 %v745_v11, %v744_v10 }
 0x3dc   : > { %1051 = vpush %v746_v12 }
 0x409   : > { %s1050_s18 = spop %1049 }
 0x40a   : > { %s735_s2 = smul.f32 0.0036764706, %s1050_s18 }
 0x40c   : > { %s749_s22 = smul.f32 %s735_s2, %s735_s2  ;;  %v752_v16 = vstv %s735_s2 }
 0x40d   : > { %s1052_s12 = spop %1051  ;;  %v753_v17 = vsub.f32 %v723_v53, %v752_v16  ;;  %v754_v18 = vsub.f32 %v724_v54, %v752_v16 }
 0x40e   : > { %s748_s11 = smul.f32 0.0036764706, %s1052_s12 }
 0x40f   : > { %v765_v20 = vmul.f32 %v758_v15, %v753_v17  ;;  %v766_v21 = vmul.f32 %v763_v19, %v754_v18 }
 0x410   : > { %s750_s13 = ssub.f32 %s748_s11, %s749_s22 }
 0x412   : > { %s751_s16 = smax.f32 %s1169_s17, %s750_s13 }
 0x413   : > { %s767_s20 = sadd.f32 1e-08, %s751_s16 }
 0x415   : > { %v768_v13 = vstv %s767_s20 }
 0x416   : > { %1124 = vrsqrt.f32 %v768_v13 }
 0x420   : > { %v1125_v14 = vpop.eup %1124 }
 0x421   : > { %1053 = vpush %v1125_v14 }
 0x452   : > { %s1054_s21 = spop %1053 }
 0x453   : > { %v771_v22 = vstv %s1054_s21 }
 0x454   : > { %v772_v24 = vmul.f32 %v771_v22, %v765_v20  ;;  %v773_v25 = vmul.f32 %v771_v22, %v766_v21 }
 0x456   : > { %v785_v27 = vadd.f32 %v782_v26, %v773_v25  ;;  %v784_v28 = vadd.f32 %v777_v23, %v772_v24 }
 0x458   : > { %v787_v29 = vmul.f32 %v1323_v55, %v785_v27  ;;  %v786_v30 = vmul.f32 %v1323_v55, %v784_v28 }
 0x45a   : > { %v789_v31 = vpack.c.bf16 %v787_v29, %v786_v30 }
 0x45c   : > { %1038 = vmatpush3.bf16.msra.mxu1 %v789_v31 }
 0x45f   : > { %1040 = vmatmul.mubr.msk.bf16.vlgmr.msra.gmra.mrb[0].mxu1 %vm790_vm8, %v788_v32 }
 0x52f   : > { %838 = sbr.rel (%p1018_p12) target bundleno = 1334 (0x536), region = 68 }
 0x532   : > { %v828_v33 = vpop.f32.mrb[0].mxu1 }
 0x533   : > { %v829_v34 = vadd.f32 %v828_v33, %v1299_v1  ;;  %v1041_v35 = vpop.f32.mrb[1].mxu1 }
 0x534   : > { %v831_v36 = vpop.f32.mrb[2].mxu1 }
 0x535   : > { %834 = vst [vmem:[#allocation2] sm:$0xff] %v829_v34  ;;  %v1042_v37 = vpop.f32.mrb[3].mxu1  ;;  %839 = vst [vmem:[%s1296_s28] sm:$0xff] (!%p1018_p12), %v829_v34 }
 0x536 PF: > { %s18_s9 = sadd.s32 1, %s1164_s9   ;;  %s1407_s26 = sld [smem:[#allocation4_spill]] }
 0x537   : > { %p15_p13 = scmp.ge.s32.totalorder %s18_s9, 10   ;;  %s1408_s24 = sld [smem:[#allocation5_spill]] }
 0x538   : > { %s1409_s27 = smov %s1156_s29  ;;  %s1410_s28 = smov %s1160_s30 }
 0x539   :  { %17 = sbr.rel (!%p15_p13) target bundleno = 4 (0x4), region = 119 }
 0x53c   : > { %s1411_s29 = smov %s1407_s26 }
 0x53d   : > { %s1412_s30 = smov %s1408_s24 }

</bundles_post_ra>
